<compile_context>
chip_gen: v7x
topology: tpu7x:2x2x1
jax: 0.10.0
libtpu: 0.0.40
codegen_flags: <defaults>
</compile_context>

<pallas_src>
import math

import jax
import jax.numpy as jnp
from jax import lax
from jax.experimental import pallas as pl
from jax.experimental.pallas import tpu as pltpu

_LANE = 128  # pad channel dims to multiples of this (lane width)


def _round_up(x, m):
    return ((x + m - 1) // m) * m


# ------------------------------ Mish ---------------------------------------
def _mish_fast(y):
    # mish(y) = y * tanh(softplus(y));  tanh(softplus(y)) = 1 - 2/(e^y(e^y+2)+2)
    # Only one transcendental (exp) + an approx reciprocal (EUP slot).
    e = jnp.exp(jnp.minimum(y, 20.0))
    t = 1.0 - 2.0 * pl.reciprocal(e * (e + 2.0) + 2.0, approx=True)
    return y * jnp.where(y > 20.0, 1.0, t)


def _mish_ref(y):
    # torch semantics: softplus threshold 20, exact tanh.
    sp = jnp.where(y > 20.0, y, jnp.log1p(jnp.exp(jnp.minimum(y, 20.0))))
    return y * jnp.tanh(sp)


# ---------------------------- fused kernel ----------------------------------
def resblock_kernel(x_ref, xt_ref, xb_ref, w1_ref, b1_ref, w2_ref, b2_ref,
                    o_ref, hcat_ref):
    # x_ref   : (1, TR, W, Cp)   bf16  input row tile (NHWC, channel-padded)
    # xt_ref  : (1, 1,  W, Cp)   bf16  row above the tile (clamped at border)
    # xb_ref  : (1, 1,  W, Cp)   bf16  row below the tile (clamped at border)
    # w1_ref  : (Cp, Chp)        bf16  1x1 weight, BN1 scale folded in
    # b1_ref  : (1, Chp)         f32   folded BN1 bias
    # w2_ref  : (3, 3*Chp, Cp)   bf16  3x3 weight, dx taps concatenated on K
    # b2_ref  : (1, Cp)          f32   folded BN2 bias
    # o_ref   : (1, TR, W, Cp)   bf16  output tile
    # hcat_ref: (TR+2, W, 3*Chp) bf16  VMEM scratch (hidden activ. + dx taps)
    t = pl.program_id(1)
    n_tiles = pl.num_programs(1)
    tr, w, c = x_ref.shape[1], x_ref.shape[2], x_ref.shape[3]
    ch = w1_ref.shape[1]

    # ---- BasicConv #1: 1x1 conv (+ folded BN) + Mish over TR+2 rows ----
    # Operands are already bf16, so the only materialized copy is the one the
    # MXU needs anyway; accumulation and elementwise math stay f32.
    x_core = x_ref[0]                                                # (TR,W,Cp)
    xs = jnp.concatenate([xt_ref[0], x_core, xb_ref[0]], axis=0)     # bf16
    y1 = jnp.dot(xs.reshape((tr + 2) * w, c), w1_ref[...],
                 preferred_element_type=jnp.float32)
    h = _mish_fast(y1 + b1_ref[...]).reshape(tr + 2, w, ch)          # f32
    hbf = h.astype(jnp.bfloat16)

    # Write the three dx taps straight into the bf16 hcat scratch with
    # lane-aligned channel-group stores (no f32 shifted copies / 3Ch concat):
    #   hcat[r, w, kx*Chp:(kx+1)*Chp] = h_zero_padded[r, w + kx - 1]
    zcol = jnp.zeros((tr + 2, 1, ch), jnp.bfloat16)
    hcat_ref[:, :, 0:ch] = jnp.concatenate([zcol, hbf[:, :w - 1, :]], axis=1)
    hcat_ref[:, :, ch:2 * ch] = hbf
    hcat_ref[:, :, 2 * ch:] = jnp.concatenate([hbf[:, 1:, :], zcol], axis=1)

    # Halo rows on the image border are the 3x3 conv's zero padding of h
    # (NOT Mish(BN(conv(0)))): zero them.
    @pl.when(t == 0)
    def _():
        hcat_ref[0] = jnp.zeros((w, 3 * ch), jnp.bfloat16)

    @pl.when(t == n_tiles - 1)
    def _():
        hcat_ref[tr + 1] = jnp.zeros((w, 3 * ch), jnp.bfloat16)

    # ---- BasicConv #2: 3x3 conv as 3 matmuls of K = 3*Chp (+ folded BN) ----
    # dy slices are leading-dim only -> cheap; acc starts from the dy=0 dot.
    acc = jnp.dot(hcat_ref[0:tr].reshape(tr * w, 3 * ch), w2_ref[0],
                  preferred_element_type=jnp.float32)
    for dy in range(1, 3):
        acc = acc + jnp.dot(hcat_ref[dy:dy + tr].reshape(tr * w, 3 * ch),
                            w2_ref[dy], preferred_element_type=jnp.float32)
    y2 = _mish_fast(acc + b2_ref[...])
    out = x_core.reshape(tr * w, c).astype(jnp.float32) + y2
    o_ref[0] = out.reshape(tr, w, c).astype(o_ref.dtype)


# ------------------------ VMEM budgeting / tiling ---------------------------
def _vmem_budgets():
    cap = 128 * 1024 * 1024
    try:
        cap = int(pltpu.get_tpu_info().vmem_capacity_bytes)
    except Exception:
        pass  # conservative fallback (v5e/v6e capacity)
    pick_budget = min(int(cap * 0.55), 96 * 1024 * 1024)
    vmem_limit = min(int(cap * 0.75), 112 * 1024 * 1024)
    return pick_budget, vmem_limit


def _estimate_vmem(tr, W, Cp, Chp):
    bf2, f4 = 2, 4
    io = 2 * (2 * tr * W * Cp * bf2)               # double-buffered x / out tiles
    halo = 2 * 2 * (W * Cp * bf2)                  # two 1-row halo blocks
    wts = 2 * (Cp * Chp + 9 * Chp * Cp) * bf2 + 2 * (Chp + Cp) * f4
    scratch = (tr + 2) * W * 3 * Chp * bf2         # hcat scratch
    temps = ((tr + 2) * W * Cp * bf2               # xs (bf16 conv-1 operand)
             + (tr + 2) * W * Chp * (f4 + bf2)     # h (f32) + hbf
             + tr * W * Cp * (f4 + f4))            # acc/y2 + residual f32
    return io + halo + wts + scratch + temps


def _pick_tile_rows(N, H, W, Cp, Chp, budget_bytes):
    feas = [th for th in range(1, H + 1)
            if H % th == 0 and _estimate_vmem(th, W, Cp, Chp) <= budget_bytes]
    if not feas:
        return 1
    if N % 2 == 0:
        return max(feas)
    # Odd batch: prefer an even (>=2) number of row tiles so both v7x
    # TensorCores get an equal share of the parallel grid.
    even = [th for th in feas if (H // th) % 2 == 0]
    if even:
        return max(even)
    multi = [th for th in feas if (H // th) >= 2]
    return max(multi) if multi else max(feas)


# ------------------------------- wrappers ------------------------------------
def resblock_forward_nhwc(x_nhwc, params, tile_rows=None):
    """Fused Resblock forward on channel-padded bf16 NHWC activations."""
    w1, b1, w2cat, b2 = params
    N, H, W, Cp = x_nhwc.shape
    Chp = w1.shape[1]
    if w1.shape[0] != Cp:
        raise ValueError("activation channel padding does not match weights")
    pick_budget, vmem_limit = _vmem_budgets()
    if tile_rows is None:
        tile_rows = _pick_tile_rows(N, H, W, Cp, Chp, pick_budget)
    if H % tile_rows != 0:
        raise ValueError("tile_rows must divide H")   # TODO(synk): ragged tiles
    n_tiles = H // tile_rows
    tr = tile_rows
    x_nhwc = x_nhwc.astype(jnp.bfloat16)

    return pl.pallas_call(
        resblock_kernel,
        out_shape=jax.ShapeDtypeStruct((N, H, W, Cp), jnp.bfloat16),
        grid=(N, n_tiles),
        in_specs=[
            pl.BlockSpec((1, tr, W, Cp), lambda n, t: (n, t, 0, 0)),
            pl.BlockSpec((1, 1, W, Cp),
                         lambda n, t: (n, jnp.maximum(t * tr - 1, 0), 0, 0)),
            pl.BlockSpec((1, 1, W, Cp),
                         lambda n, t: (n, jnp.minimum((t + 1) * tr, H - 1), 0, 0)),
            pl.BlockSpec((Cp, Chp), lambda n, t: (0, 0)),
            pl.BlockSpec((1, Chp), lambda n, t: (0, 0)),
            pl.BlockSpec((3, 3 * Chp, Cp), lambda n, t: (0, 0, 0)),
            pl.BlockSpec((1, Cp), lambda n, t: (0, 0)),
        ],
        out_specs=pl.BlockSpec((1, tr, W, Cp), lambda n, t: (n, t, 0, 0)),
        scratch_shapes=[pltpu.VMEM((tr + 2, W, 3 * Chp), jnp.bfloat16)],
        compiler_params=pltpu.CompilerParams(
            dimension_semantics=("parallel", "parallel"),
            vmem_limit_bytes=vmem_limit),
    )(x_nhwc, x_nhwc, x_nhwc, w1, b1, w2cat, b2)


def resblock_forward(x_nchw, params, tile_rows=None):
    # NCHW wrapper matching the PyTorch module boundary.  When stacking many
    # blocks, keep activations bf16 / NHWC / channel-padded and call
    # resblock_forward_nhwc directly so transpose+pad happen once per network.
    N, C, H, W = x_nchw.shape
    Cp = params[0].shape[0]
    x = jnp.transpose(x_nchw, (0, 2, 3, 1)).astype(jnp.bfloat16)
    if Cp > C:
        x = jnp.pad(x, ((0, 0), (0, 0), (0, 0), (0, Cp - C)))
    out = resblock_forward_nhwc(x, params, tile_rows)
    return jnp.transpose(out[..., :C], (0, 3, 1, 2))


# -------------------- deterministic parameter init --------------------------
def init_params(key, C, Ch, eps=1e-5, lane=_LANE):
    ks = jax.random.split(key, 10)

    # conv1: torch layout (Ch, C, 1, 1); BN1 (gamma, beta, mean, var)
    w1_pt = jax.random.normal(ks[0], (Ch, C, 1, 1), jnp.float32) / math.sqrt(C)
    g1 = 1.0 + 0.1 * jax.random.normal(ks[1], (Ch,), jnp.float32)
    beta1 = 0.1 * jax.random.normal(ks[2], (Ch,), jnp.float32)
    m1 = 0.1 * jax.random.normal(ks[3], (Ch,), jnp.float32)
    v1 = jnp.abs(jax.random.normal(ks[4], (Ch,), jnp.float32)) + 0.5
    s1 = g1 / jnp.sqrt(v1 + eps)
    b1 = beta1 - m1 * s1

    # conv2: torch layout (C, Ch, 3, 3); BN2
    w2_pt = jax.random.normal(ks[5], (C, Ch, 3, 3), jnp.float32) / math.sqrt(9 * Ch)
    g2 = 1.0 + 0.1 * jax.random.normal(ks[6], (C,), jnp.float32)
    beta2 = 0.1 * jax.random.normal(ks[7], (C,), jnp.float32)
    m2 = 0.1 * jax.random.normal(ks[8], (C,), jnp.float32)
    v2 = jnp.abs(jax.random.normal(ks[9], (C,), jnp.float32)) + 0.5
    s2 = g2 / jnp.sqrt(v2 + eps)
    b2 = beta2 - m2 * s2

    # Fold BN scales into the conv weights (host side, mathematically identical).
    w1_eff = jnp.transpose(w1_pt[:, :, 0, 0], (1, 0)) * s1[None, :]          # (C, Ch)
    w2_hwio = jnp.transpose(w2_pt, (2, 3, 1, 0)) * s2[None, None, None, :]   # (3,3,Ch,C)

    # Lane-dense padding (zeros): padded channels contribute exact zeros.
    Cp, Chp = _round_up(C, lane), _round_up(Ch, lane)
    w1_pad = jnp.zeros((Cp, Chp), jnp.float32).at[:C, :Ch].set(w1_eff)
    b1_pad = jnp.zeros((Chp,), jnp.float32).at[:Ch].set(b1)
    w2_pad = jnp.zeros((3, 3, Chp, Cp), jnp.float32).at[:, :, :Ch, :C].set(w2_hwio)
    b2_pad = jnp.zeros((Cp,), jnp.float32).at[:C].set(b2)
    w2cat = w2_pad.reshape(3, 3 * Chp, Cp)                                   # dx taps on K

    kernel_params = (w1_pad.astype(jnp.bfloat16), b1_pad.reshape(1, Chp),
                     w2cat.astype(jnp.bfloat16), b2_pad.reshape(1, Cp))
    ref_params = (w1_eff.astype(jnp.bfloat16), b1,
                  w2_hwio.astype(jnp.bfloat16), b2)
    return kernel_params, ref_params


# ------------------------- pure-JAX reference --------------------------------
def resblock_reference(x_nchw, ref_params):
    """Mirrors kernel numerics: bf16 activations/operands, f32 accumulation."""
    w1_q, b1, w2_q, b2 = ref_params
    x = jnp.transpose(x_nchw, (0, 2, 3, 1))
    xq = x.astype(jnp.bfloat16).astype(jnp.float32)        # kernel input is bf16
    w1f = w1_q.astype(jnp.float32)[None, None]              # (1,1,C,Ch)
    h = lax.conv_general_dilated(xq, w1f, (1, 1), "SAME",
                                 dimension_numbers=("NHWC", "HWIO", "NHWC"))
    h = _mish_ref(h + b1.reshape(1, 1, 1, -1))
    hq = h.astype(jnp.bfloat16).astype(jnp.float32)
    w2f = w2_q.astype(jnp.float32)                           # (3,3,Ch,C)
    y = lax.conv_general_dilated(hq, w2f, (1, 1), "SAME",
                                 dimension_numbers=("NHWC", "HWIO", "NHWC"))
    y = _mish_ref(y + b2.reshape(1, 1, 1, -1))
    out = (xq + y).astype(jnp.bfloat16).astype(jnp.float32)  # kernel output is bf16
    return jnp.transpose(out, (0, 3, 1, 2))


def _errors(a_bf16, ref_f32):
    a = a_bf16.astype(jnp.float32)
    d = jnp.abs(a - ref_f32)
    rel = d / (1.0 + jnp.abs(ref_f32))
    return float(jnp.max(rel)), float(jnp.mean(d))


if __name__ == "__main__":
    # Primary config (module defaults: hidden_channels == channels).
    N, C, H, W = 2, 4, 16, 16
    Ch = C
    key = jax.random.PRNGKey(0)
    kx, kp, kx2, kp2 = jax.random.split(key, 4)

    x = jax.random.normal(kx, (N, C, H, W), jnp.float32)
    params, ref_params = init_params(kp, C, Ch)

    out = jax.block_until_ready(resblock_forward(x, params, tile_rows=8))  # halo path
    ref = resblock_reference(x, ref_params)
    assert out.shape == (N, C, H, W)
    rel_max, abs_mean = _errors(out, ref)
    # Both sides quantize activations / the output to bf16; remaining error is
    # bf16 rounding flips + the approx-reciprocal Mish vs exact tanh(softplus).
    assert rel_max < 2.5e-2 and abs_mean < 5e-3, (rel_max, abs_mean)

    # Secondary config: hidden_channels != channels, auto tile picker.
    x2 = jax.random.normal(kx2, (1, 8, 8, 8), jnp.float32)
    params2, ref_params2 = init_params(kp2, 8, 16)
    out2 = jax.block_until_ready(resblock_forward(x2, params2))
    ref2 = resblock_reference(x2, ref_params2)
    rel_max2, abs_mean2 = _errors(out2, ref2)
    assert rel_max2 < 2.5e-2 and abs_mean2 < 5e-3, (rel_max2, abs_mean2)

    print("KERNEL_OK")
</pallas_src>

<mosaic_0001>
module attributes {stable_mosaic.version = 11 : i64} {
  func.func @resblock_kernel(%arg0: i32, %arg1: i32, %arg2: memref<1x8x16x128xbf16, #tpu.memory_space<vmem>>, %arg3: memref<1x1x16x128xbf16, #tpu.memory_space<vmem>>, %arg4: memref<1x1x16x128xbf16, #tpu.memory_space<vmem>>, %arg5: memref<128x128xbf16, #tpu.memory_space<vmem>>, %arg6: memref<1x128xf32, #tpu.memory_space<vmem>>, %arg7: memref<3x384x128xbf16, #tpu.memory_space<vmem>>, %arg8: memref<1x128xf32, #tpu.memory_space<vmem>>, %arg9: memref<1x8x16x128xbf16, #tpu.memory_space<vmem>>, %arg10: memref<10x16x384xbf16, #tpu.memory_space<vmem>>) attributes {dimension_semantics = [#tpu.dimension_semantics<parallel>, #tpu.dimension_semantics<parallel>], iteration_bounds = array<i64: 2, 2>, scalar_prefetch = 0 : i64, scratch_operands = 1 : i64, tpu.core_type = #tpu.core_type<tc>, window_params = [{transform_indices = @transform_0, window_bounds = array<i64: 1, 8, 16, 128>}, {transform_indices = @transform_1, window_bounds = array<i64: 1, 1, 16, 128>}, {transform_indices = @transform_2, window_bounds = array<i64: 1, 1, 16, 128>}, {pipeline_mode = #tpu.pipeline_mode<synchronous>, transform_indices = @transform_3, window_bounds = array<i64: 128, 128>}, {pipeline_mode = #tpu.pipeline_mode<synchronous>, transform_indices = @transform_4, window_bounds = array<i64: 1, 128>}, {pipeline_mode = #tpu.pipeline_mode<synchronous>, transform_indices = @transform_5, window_bounds = array<i64: 3, 384, 128>}, {pipeline_mode = #tpu.pipeline_mode<synchronous>, transform_indices = @transform_6, window_bounds = array<i64: 1, 128>}, {transform_indices = @transform_7, window_bounds = array<i64: 1, 8, 16, 128>}]} {
    %c0 = arith.constant 0 : index
    %c0_0 = arith.constant 0 : index
    %c0_1 = arith.constant 0 : index
    %c0_2 = arith.constant 0 : index
    %0 = vector.load %arg2[%c0, %c0_0, %c0_1, %c0_2] : memref<1x8x16x128xbf16, #tpu.memory_space<vmem>>, vector<1x8x16x128xbf16>
    %1 = vector.shape_cast %0 : vector<1x8x16x128xbf16> to vector<8x16x128xbf16>
    %c0_3 = arith.constant 0 : index
    %c0_4 = arith.constant 0 : index
    %c0_5 = arith.constant 0 : index
    %c0_6 = arith.constant 0 : index
    %2 = vector.load %arg3[%c0_3, %c0_4, %c0_5, %c0_6] : memref<1x1x16x128xbf16, #tpu.memory_space<vmem>>, vector<1x1x16x128xbf16>
    %3 = vector.shape_cast %2 : vector<1x1x16x128xbf16> to vector<1x16x128xbf16>
    %c0_7 = arith.constant 0 : index
    %c0_8 = arith.constant 0 : index
    %c0_9 = arith.constant 0 : index
    %c0_10 = arith.constant 0 : index
    %4 = vector.load %arg4[%c0_7, %c0_8, %c0_9, %c0_10] : memref<1x1x16x128xbf16, #tpu.memory_space<vmem>>, vector<1x1x16x128xbf16>
    %5 = vector.shape_cast %4 : vector<1x1x16x128xbf16> to vector<1x16x128xbf16>
    %6 = tpu.concatenate %3, %1, %5 in 0 : vector<1x16x128xbf16>, vector<8x16x128xbf16>, vector<1x16x128xbf16> -> vector<10x16x128xbf16>
    %7 = vector.shape_cast %6 : vector<10x16x128xbf16> to vector<160x128xbf16>
    %c0_11 = arith.constant 0 : index
    %c0_12 = arith.constant 0 : index
    %8 = vector.load %arg5[%c0_11, %c0_12] : memref<128x128xbf16, #tpu.memory_space<vmem>>, vector<128x128xbf16>
    %cst = arith.constant dense<0.000000e+00> : vector<160x128xf32>
    %9 = tpu.matmul %7, %8, %cst {dimension_numbers = #tpu.dot_dimension_numbers<[1], [0], [0], [1], [0, 0, 1, 1], [], []>} : vector<160x128xbf16>, vector<128x128xbf16>, vector<160x128xf32> -> vector<160x128xf32>
    %c0_13 = arith.constant 0 : index
    %c0_14 = arith.constant 0 : index
    %10 = vector.load %arg6[%c0_13, %c0_14] : memref<1x128xf32, #tpu.memory_space<vmem>>, vector<1x128xf32>
    %11 = vector.broadcast %10 : vector<1x128xf32> to vector<160x128xf32>
    %12 = arith.addf %9, %11 : vector<160x128xf32>
    %cst_15 = arith.constant 2.000000e+01 : f32
    %13 = vector.broadcast %cst_15 : f32 to vector<160x128xf32>
    %14 = arith.minimumf %12, %13 : vector<160x128xf32>
    %15 = math.exp %14 : vector<160x128xf32>
    %cst_16 = arith.constant 2.000000e+00 : f32
    %16 = vector.broadcast %cst_16 : f32 to vector<160x128xf32>
    %17 = arith.addf %15, %16 : vector<160x128xf32>
    %18 = arith.mulf %15, %17 : vector<160x128xf32>
    %cst_17 = arith.constant 2.000000e+00 : f32
    %19 = vector.broadcast %cst_17 : f32 to vector<160x128xf32>
    %20 = arith.addf %18, %19 : vector<160x128xf32>
    %21 = tpu.reciprocal %20 {approx = true} : vector<160x128xf32> -> vector<160x128xf32>
    %cst_18 = arith.constant 2.000000e+00 : f32
    %22 = vector.broadcast %cst_18 : f32 to vector<160x128xf32>
    %23 = arith.mulf %22, %21 : vector<160x128xf32>
    %cst_19 = arith.constant 1.000000e+00 : f32
    %24 = vector.broadcast %cst_19 : f32 to vector<160x128xf32>
    %25 = arith.subf %24, %23 : vector<160x128xf32>
    %cst_20 = arith.constant 2.000000e+01 : f32
    %26 = vector.broadcast %cst_20 : f32 to vector<160x128xf32>
    %27 = arith.cmpf ogt, %12, %26 : vector<160x128xf32>
    %cst_21 = arith.constant 1.000000e+00 : f32
    %28 = vector.broadcast %cst_21 : f32 to vector<160x128xf32>
    %29 = arith.select %27, %28, %25 : vector<160x128xi1>, vector<160x128xf32>
    %30 = arith.mulf %12, %29 : vector<160x128xf32>
    %31 = vector.shape_cast %30 : vector<160x128xf32> to vector<10x16x128xf32>
    %32 = arith.truncf %31 : vector<10x16x128xf32> to vector<10x16x128xbf16>
    %cst_22 = arith.constant 0.000000e+00 : bf16
    %33 = vector.broadcast %cst_22 : bf16 to vector<10x1x128xbf16>
    %34 = vector.extract_strided_slice %32 {offsets = [0, 0, 0], sizes = [10, 15, 128], strides = [1, 1, 1]} : vector<10x16x128xbf16> to vector<10x15x128xbf16>
    %35 = tpu.concatenate %33, %34 in 1 : vector<10x1x128xbf16>, vector<10x15x128xbf16> -> vector<10x16x128xbf16>
    %c0_23 = arith.constant 0 : index
    %c0_24 = arith.constant 0 : index
    %c0_25 = arith.constant 0 : index
    %36 = vector.load %arg10[%c0_23, %c0_24, %c0_25] : memref<10x16x384xbf16, #tpu.memory_space<vmem>>, vector<10x16x128xbf16>
    tpu.vector_store %arg10[%c0_23, %c0_24, %c0_25], %35 {strides = array<i32>} : memref<10x16x384xbf16, #tpu.memory_space<vmem>>, vector<10x16x128xbf16>,
    %c0_26 = arith.constant 0 : index
    %c0_27 = arith.constant 0 : index
    %c128 = arith.constant 128 : index
    %37 = vector.load %arg10[%c0_26, %c0_27, %c128] : memref<10x16x384xbf16, #tpu.memory_space<vmem>>, vector<10x16x128xbf16>
    tpu.vector_store %arg10[%c0_26, %c0_27, %c128], %32 {strides = array<i32>} : memref<10x16x384xbf16, #tpu.memory_space<vmem>>, vector<10x16x128xbf16>,
    %38 = vector.extract_strided_slice %32 {offsets = [0, 1, 0], sizes = [10, 15, 128], strides = [1, 1, 1]} : vector<10x16x128xbf16> to vector<10x15x128xbf16>
    %39 = tpu.concatenate %38, %33 in 1 : vector<10x15x128xbf16>, vector<10x1x128xbf16> -> vector<10x16x128xbf16>
    %c0_28 = arith.constant 0 : index
    %c0_29 = arith.constant 0 : index
    %c256 = arith.constant 256 : index
    %40 = vector.load %arg10[%c0_28, %c0_29, %c256] : memref<10x16x384xbf16, #tpu.memory_space<vmem>>, vector<10x16x128xbf16>
    tpu.vector_store %arg10[%c0_28, %c0_29, %c256], %39 {strides = array<i32>} : memref<10x16x384xbf16, #tpu.memory_space<vmem>>, vector<10x16x128xbf16>,
    %c0_i32 = arith.constant 0 : i32
    %41 = arith.cmpi eq, %arg1, %c0_i32 : i32
    %42 = arith.extui %41 : i1 to i32
    %c0_i32_30 = arith.constant 0 : i32
    %43 = arith.cmpi ne, %42, %c0_i32_30 : i32
    scf.if %43 {
      %cst_64 = arith.constant 0.000000e+00 : bf16
      %93 = vector.broadcast %cst_64 : bf16 to vector<16x384xbf16>
      %c0_65 = arith.constant 0 : index
      %c0_66 = arith.constant 0 : index
      %c0_67 = arith.constant 0 : index
      %94 = vector.load %arg10[%c0_65, %c0_66, %c0_67] : memref<10x16x384xbf16, #tpu.memory_space<vmem>>, vector<1x16x384xbf16>
      %95 = vector.shape_cast %94 : vector<1x16x384xbf16> to vector<16x384xbf16>
      %96 = vector.shape_cast %93 : vector<16x384xbf16> to vector<1x16x384xbf16>
      tpu.vector_store %arg10[%c0_65, %c0_66, %c0_67], %96 {strides = array<i32>} : memref<10x16x384xbf16, #tpu.memory_space<vmem>>, vector<1x16x384xbf16>,
    } else {
    }
    %c1_i32 = arith.constant 1 : i32
    %44 = arith.cmpi eq, %arg1, %c1_i32 : i32
    %45 = arith.extui %44 : i1 to i32
    %c0_i32_31 = arith.constant 0 : i32
    %46 = arith.cmpi ne, %45, %c0_i32_31 : i32
    scf.if %46 {
      %cst_64 = arith.constant 0.000000e+00 : bf16
      %93 = vector.broadcast %cst_64 : bf16 to vector<16x384xbf16>
      %c9 = arith.constant 9 : index
      %c0_65 = arith.constant 0 : index
      %c0_66 = arith.constant 0 : index
      %94 = vector.load %arg10[%c9, %c0_65, %c0_66] : memref<10x16x384xbf16, #tpu.memory_space<vmem>>, vector<1x16x384xbf16>
      %95 = vector.shape_cast %94 : vector<1x16x384xbf16> to vector<16x384xbf16>
      %96 = vector.shape_cast %93 : vector<16x384xbf16> to vector<1x16x384xbf16>
      tpu.vector_store %arg10[%c9, %c0_65, %c0_66], %96 {strides = array<i32>} : memref<10x16x384xbf16, #tpu.memory_space<vmem>>, vector<1x16x384xbf16>,
    } else {
    }
    %c0_32 = arith.constant 0 : index
    %c0_33 = arith.constant 0 : index
    %c0_34 = arith.constant 0 : index
    %47 = vector.load %arg10[%c0_32, %c0_33, %c0_34] : memref<10x16x384xbf16, #tpu.memory_space<vmem>>, vector<8x16x384xbf16>
    %48 = vector.shape_cast %47 : vector<8x16x384xbf16> to vector<128x384xbf16>
    %c0_35 = arith.constant 0 : index
    %c0_36 = arith.constant 0 : index
    %c0_37 = arith.constant 0 : index
    %49 = vector.load %arg7[%c0_35, %c0_36, %c0_37] : memref<3x384x128xbf16, #tpu.memory_space<vmem>>, vector<1x384x128xbf16>
    %50 = vector.shape_cast %49 : vector<1x384x128xbf16> to vector<384x128xbf16>
    %cst_38 = arith.constant dense<0.000000e+00> : vector<128x128xf32>
    %51 = tpu.matmul %48, %50, %cst_38 {dimension_numbers = #tpu.dot_dimension_numbers<[1], [0], [0], [1], [0, 0, 1, 1], [], []>} : vector<128x384xbf16>, vector<384x128xbf16>, vector<128x128xf32> -> vector<128x128xf32>
    %c1 = arith.constant 1 : index
    %c0_39 = arith.constant 0 : index
    %c0_40 = arith.constant 0 : index
    %52 = vector.load %arg10[%c1, %c0_39, %c0_40] : memref<10x16x384xbf16, #tpu.memory_space<vmem>>, vector<8x16x384xbf16>
    %53 = vector.shape_cast %52 : vector<8x16x384xbf16> to vector<128x384xbf16>
    %c1_41 = arith.constant 1 : index
    %c0_42 = arith.constant 0 : index
    %c0_43 = arith.constant 0 : index
    %54 = vector.load %arg7[%c1_41, %c0_42, %c0_43] : memref<3x384x128xbf16, #tpu.memory_space<vmem>>, vector<1x384x128xbf16>
    %55 = vector.shape_cast %54 : vector<1x384x128xbf16> to vector<384x128xbf16>
    %cst_44 = arith.constant dense<0.000000e+00> : vector<128x128xf32>
    %56 = tpu.matmul %53, %55, %cst_44 {dimension_numbers = #tpu.dot_dimension_numbers<[1], [0], [0], [1], [0, 0, 1, 1], [], []>} : vector<128x384xbf16>, vector<384x128xbf16>, vector<128x128xf32> -> vector<128x128xf32>
    %57 = arith.addf %51, %56 : vector<128x128xf32>
    %c2 = arith.constant 2 : index
    %c0_45 = arith.constant 0 : index
    %c0_46 = arith.constant 0 : index
    %58 = vector.load %arg10[%c2, %c0_45, %c0_46] : memref<10x16x384xbf16, #tpu.memory_space<vmem>>, vector<8x16x384xbf16>
    %59 = vector.shape_cast %58 : vector<8x16x384xbf16> to vector<128x384xbf16>
    %c2_47 = arith.constant 2 : index
    %c0_48 = arith.constant 0 : index
    %c0_49 = arith.constant 0 : index
    %60 = vector.load %arg7[%c2_47, %c0_48, %c0_49] : memref<3x384x128xbf16, #tpu.memory_space<vmem>>, vector<1x384x128xbf16>
    %61 = vector.shape_cast %60 : vector<1x384x128xbf16> to vector<384x128xbf16>
    %cst_50 = arith.constant dense<0.000000e+00> : vector<128x128xf32>
    %62 = tpu.matmul %59, %61, %cst_50 {dimension_numbers = #tpu.dot_dimension_numbers<[1], [0], [0], [1], [0, 0, 1, 1], [], []>} : vector<128x384xbf16>, vector<384x128xbf16>, vector<128x128xf32> -> vector<128x128xf32>
    %63 = arith.addf %57, %62 : vector<128x128xf32>
    %c0_51 = arith.constant 0 : index
    %c0_52 = arith.constant 0 : index
    %64 = vector.load %arg8[%c0_51, %c0_52] : memref<1x128xf32, #tpu.memory_space<vmem>>, vector<1x128xf32>
    %65 = vector.broadcast %64 : vector<1x128xf32> to vector<128x128xf32>
    %66 = arith.addf %63, %65 : vector<128x128xf32>
    %cst_53 = arith.constant 2.000000e+01 : f32
    %67 = vector.broadcast %cst_53 : f32 to vector<128x128xf32>
    %68 = arith.minimumf %66, %67 : vector<128x128xf32>
    %69 = math.exp %68 : vector<128x128xf32>
    %cst_54 = arith.constant 2.000000e+00 : f32
    %70 = vector.broadcast %cst_54 : f32 to vector<128x128xf32>
    %71 = arith.addf %69, %70 : vector<128x128xf32>
    %72 = arith.mulf %69, %71 : vector<128x128xf32>
    %cst_55 = arith.constant 2.000000e+00 : f32
    %73 = vector.broadcast %cst_55 : f32 to vector<128x128xf32>
    %74 = arith.addf %72, %73 : vector<128x128xf32>
    %75 = tpu.reciprocal %74 {approx = true} : vector<128x128xf32> -> vector<128x128xf32>
    %cst_56 = arith.constant 2.000000e+00 : f32
    %76 = vector.broadcast %cst_56 : f32 to vector<128x128xf32>
    %77 = arith.mulf %76, %75 : vector<128x128xf32>
    %cst_57 = arith.constant 1.000000e+00 : f32
    %78 = vector.broadcast %cst_57 : f32 to vector<128x128xf32>
    %79 = arith.subf %78, %77 : vector<128x128xf32>
    %cst_58 = arith.constant 2.000000e+01 : f32
    %80 = vector.broadcast %cst_58 : f32 to vector<128x128xf32>
    %81 = arith.cmpf ogt, %66, %80 : vector<128x128xf32>
    %cst_59 = arith.constant 1.000000e+00 : f32
    %82 = vector.broadcast %cst_59 : f32 to vector<128x128xf32>
    %83 = arith.select %81, %82, %79 : vector<128x128xi1>, vector<128x128xf32>
    %84 = arith.mulf %66, %83 : vector<128x128xf32>
    %85 = vector.shape_cast %1 : vector<8x16x128xbf16> to vector<128x128xbf16>
    %86 = arith.extf %85 : vector<128x128xbf16> to vector<128x128xf32>
    %87 = arith.addf %86, %84 : vector<128x128xf32>
    %88 = vector.shape_cast %87 : vector<128x128xf32> to vector<8x16x128xf32>
    %89 = arith.truncf %88 : vector<8x16x128xf32> to vector<8x16x128xbf16>
    %c0_60 = arith.constant 0 : index
    %c0_61 = arith.constant 0 : index
    %c0_62 = arith.constant 0 : index
    %c0_63 = arith.constant 0 : index
    %90 = vector.load %arg9[%c0_60, %c0_61, %c0_62, %c0_63] : memref<1x8x16x128xbf16, #tpu.memory_space<vmem>>, vector<1x8x16x128xbf16>
    %91 = vector.shape_cast %90 : vector<1x8x16x128xbf16> to vector<8x16x128xbf16>
    %92 = vector.shape_cast %89 : vector<8x16x128xbf16> to vector<1x8x16x128xbf16>
    tpu.vector_store %arg9[%c0_60, %c0_61, %c0_62, %c0_63], %92 {strides = array<i32>} : memref<1x8x16x128xbf16, #tpu.memory_space<vmem>>, vector<1x8x16x128xbf16>,
    return
  }
  func.func @transform_0(%arg0: i32, %arg1: i32) -> (i32, i32, i32, i32) {
    %c0_i32 = arith.constant 0 : i32
    %c0_i32_0 = arith.constant 0 : i32
    %c0_i32_1 = arith.constant 0 : i32
    return %arg0, %arg1, %c0_i32, %c0_i32_0 : i32, i32, i32, i32
  }
  func.func @transform_1(%arg0: i32, %arg1: i32) -> (i32, i32, i32, i32) {
    %c8_i32 = arith.constant 8 : i32
    %0 = arith.muli %arg1, %c8_i32 : i32
    %c1_i32 = arith.constant 1 : i32
    %1 = arith.subi %0, %c1_i32 : i32
    %c0_i32 = arith.constant 0 : i32
    %2 = arith.maxsi %1, %c0_i32 : i32
    %c0_i32_0 = arith.constant 0 : i32
    %c0_i32_1 = arith.constant 0 : i32
    %c0_i32_2 = arith.constant 0 : i32
    return %arg0, %2, %c0_i32_0, %c0_i32_1 : i32, i32, i32, i32
  }
  func.func @transform_2(%arg0: i32, %arg1: i32) -> (i32, i32, i32, i32) {
    %c1_i32 = arith.constant 1 : i32
    %0 = arith.addi %arg1, %c1_i32 : i32
    %c8_i32 = arith.constant 8 : i32
    %1 = arith.muli %0, %c8_i32 : i32
    %c15_i32 = arith.constant 15 : i32
    %2 = arith.minsi %1, %c15_i32 : i32
    %c0_i32 = arith.constant 0 : i32
    %c0_i32_0 = arith.constant 0 : i32
    %c0_i32_1 = arith.constant 0 : i32
    return %arg0, %2, %c0_i32, %c0_i32_0 : i32, i32, i32, i32
  }
  func.func @transform_3(%arg0: i32, %arg1: i32) -> (i32, i32) {
    %c0_i32 = arith.constant 0 : i32
    %c0_i32_0 = arith.constant 0 : i32
    %c0_i32_1 = arith.constant 0 : i32
    return %c0_i32, %c0_i32_0 : i32, i32
  }
  func.func @transform_4(%arg0: i32, %arg1: i32) -> (i32, i32) {
    %c0_i32 = arith.constant 0 : i32
    %c0_i32_0 = arith.constant 0 : i32
    %c0_i32_1 = arith.constant 0 : i32
    return %c0_i32, %c0_i32_0 : i32, i32
  }
  func.func @transform_5(%arg0: i32, %arg1: i32) -> (i32, i32, i32) {
    %c0_i32 = arith.constant 0 : i32
    %c0_i32_0 = arith.constant 0 : i32
    %c0_i32_1 = arith.constant 0 : i32
    %c0_i32_2 = arith.constant 0 : i32
    return %c0_i32, %c0_i32_0, %c0_i32_1 : i32, i32, i32
  }
  func.func @transform_6(%arg0: i32, %arg1: i32) -> (i32, i32) {
    %c0_i32 = arith.constant 0 : i32
    %c0_i32_0 = arith.constant 0 : i32
    %c0_i32_1 = arith.constant 0 : i32
    return %c0_i32, %c0_i32_0 : i32, i32
  }
  func.func @transform_7(%arg0: i32, %arg1: i32) -> (i32, i32, i32, i32) {
    %c0_i32 = arith.constant 0 : i32
    %c0_i32_0 = arith.constant 0 : i32
    %c0_i32_1 = arith.constant 0 : i32
    return %arg0, %arg1, %c0_i32, %c0_i32_0 : i32, i32, i32, i32
  }
}

</mosaic_0001>

<bundles_post_ra>
// kernel: tpu_custom_call.1
= control target key start
LH: loop header
LB: loop body
LE: loop exit
PB: predicated region body
PF: predicated region fallthrough
CT: control target
= control target key end

     0   :  { %s5666_s0 = inlined_call_operand.hbm [shape: bf16[2,16,16,128], index: 0, kind: input, shape index: {}]   ;;  %s5667_s1 = inlined_call_operand.hbm [shape: bf16[2,16,16,128], index: 1, kind: input, shape index: {}]   ;;  %s5668_s2 = inlined_call_operand.hbm [shape: bf16[2,16,16,128], index: 2, kind: input, shape index: {}]   ;;  %s5669_s3 = inlined_call_operand.hbm [shape: bf16[128,128], index: 3, kind: input, shape index: {}]   ;;  %s5670_s4 = inlined_call_operand.hbm [shape: f32[1,128], index: 4, kind: input, shape index: {}]   ;;  %s5671_s5 = inlined_call_operand.hbm [shape: bf16[3,384,128], index: 5, kind: input, shape index: {}]   ;;  %s5672_s6 = inlined_call_operand.hbm [shape: f32[1,128], index: 6, kind: input, shape index: {}]   ;;  %s5673_s7 = inlined_call_operand.hbm [shape: bf16[2,16,16,128], index: 7, kind: output, shape index: {}]  }
   0x1   :  { %5704 = sst [smem:[#allocation36_spill]] %s5666_s0 }
   0x2   :  { %5705 = sst [smem:[#allocation37_spill]] %s5667_s1 }
   0x3   :  { %5706 = sst [smem:[#allocation38_spill]] %s5668_s2 }
   0x4   :  { %5707 = sst [smem:[#allocation39_spill]] %s5669_s3 }
   0x5   :  { %5708 = sst [smem:[#allocation40_spill]] %s5670_s4 }
   0x6   :  { %5709 = sst [smem:[#allocation41_spill]] %s5671_s5 }
   0x7   :  { %5710 = sst [smem:[#allocation42_spill]] %s5672_s6 }
   0x8   :  { %5711 = sst [smem:[#allocation43_spill]] %s5673_s7 }
   0x9   :  { %12 = vsyncpa [#allocation4], 0 }
   0xa   :  { %14 = vsyncpa [#allocation4 + $0x1], 0 }
   0xb   :  { %15 = vsyncpa [#allocation7], 0 }
   0xc   :  { %17 = vsyncpa [#allocation7 + $0x1], 0 }
   0xd   :  { %18 = vsyncpa [#allocation10], 0 }
   0xe   :  { %19 = vsyncpa [#allocation13], 0 }
   0xf   :  { %20 = vsyncpa [#allocation5], 0 }
  0x10   :  { %22 = vsyncpa [#allocation5 + $0x1], 0  ;;  %s4498_s24 = smov 0   ;;  %s4500_s25 = smov 0  }
  0x11   :  { %s4502_s26 = smov 0   ;;  %s4504_s27 = smov 0  }
  0x12   :  { %s4506_s28 = smov 0   ;;  %s4508_s29 = smov 0  }
  0x13   :  { %s4510_s30 = smov 0   ;;  %s4512_s8 = smov 0  }
  0x14   :  { %s4514_s9 = smov 0   ;;  %s4516_s10 = smov 0  }
  0x15   :  { %s4518_s11 = smov 0   ;;  %s4520_s12 = smov 0  }
  0x16   :  { %s4522_s13 = smov 0   ;;  %s4524_s14 = smov 0  }
  0x17 LB: > { %5712 = sst [smem:[#allocation22_spill]] %s4390_s24  ;;  %s4569_s15 = sadd.s32 4294967295, %s4442_s14   ;;  %s4442_s14 = sphi %s4524_s14, %s28_s14   ;;  %s4438_s13 = sphi %s4522_s13, %s5796_s13   ;;  %s4434_s12 = sphi %s4520_s12, %s5806_s12   ;;  %s4430_s11 = sphi %s4518_s11, %s5805_s11   ;;  %s4426_s10 = sphi %s4516_s10, %s5793_s10   ;;  %s4422_s9 = sphi %s4514_s9, %s5804_s9   ;;  %s4418_s8 = sphi %s4512_s8, %s5803_s8   ;;  %s4414_s30 = sphi %s4510_s30, %s5802_s30   ;;  %s4410_s29 = sphi %s4508_s29, %s5801_s29   ;;  %s4406_s28 = sphi %s4506_s28, %s5800_s28   ;;  %s4402_s27 = sphi %s4504_s27, %s5799_s27   ;;  %s4398_s26 = sphi %s4502_s26, %s5798_s26   ;;  %s4394_s25 = sphi %s4500_s25, %s5790_s25   ;;  %s4390_s24 = sphi %s4498_s24, %s5789_s24  }
  0x18   : > { %5713 = sst [smem:[#allocation23_spill]] %s4394_s25  ;;  %p2964_p0 = scmp.ge.s32.totalorder %s4442_s14, 1 }
  0x19   : > { %5714 = sst [smem:[#allocation24_spill]] %s4398_s26  ;;  %p5676_p1 = scmp.eq.s32.totalorder %s4569_s15, 0 }
  0x1a   : > { %5715 = sst [smem:[#allocation25_spill]] %s4406_s28  ;;  %p257_p2 = scmp.lt.s32.totalorder %s4442_s14, 5 }
  0x1b   : > { %5716 = sst [smem:[#allocation26_spill]] %s4426_s10  ;;  %s4444_s17 = smov [#allocation9]  }
  0x1c   : > { %5717 = sst [smem:[#allocation27_spill]] %s4430_s11  ;;  %p4574_p3 = pnand %p2964_p0, %p257_p2 }
  0x1d   : > { %5718 = sst [smem:[#allocation28_spill]] %s4434_s12  ;;  %s269_s18 = sshll.u32 %s4444_s17, 4  ;;  %s270_s18 = int_to_ptr.vmem [resolvable:$true] %s269_s18 }
  0x1e   : > { %5719 = sst [smem:[#allocation29_spill]] %s4438_s13  ;;  %p3677_p4 = pneg %p4574_p3 }
  0x1f   : > { %s5720_s16 = scalar_select %p4574_p3, 1, 0 }
  0x20   : > { %p4582_p5 = pnand %p3677_p4, %p5676_p1  ;;  %s4445_s20 = smov [#allocation12]  }
  0x21   : > { %5721 = sst [smem:[#allocation30_spill]] %s5720_s16  ;;  %s293_s21 = sshll.u32 %s4445_s20, 4  ;;  %s4586_s21 = int_to_ptr.vmem [resolvable:$true] %s293_s21 }
  0x22   : > { %s5722_s19 = scalar_select %p4582_p5, 1, 0 }
  0x23   : > { %s5723_s3 = sld [smem:[#allocation39_spill]]  ;;  %p4596_p7 = pneg %p4582_p5 }
  0x29   : > { %s4078_s7 = scalar_lea.hbm %s5723_s3, 1024 }
  0x2a   : > { %p4079_p6 = scmp.ne.s32.totalorder %s5723_s3, %s4078_s7  ;;  %p4085_p10 = scmp.lt.u32.totalorder %s4078_s7, %s5723_s3 }
  0x2c   : > { %p4081_p8 = pnand %p4596_p7, %p4079_p6 }
  0x2e   : > { %p4082_p9 = pneg %p4081_p8 }
  0x30   : > { %p4087_p11 = pnand %p4085_p10, %p4082_p9 }
  0x32   : > { %4090 = shalt.err (!%p4087_p11)
}
  0x33   : > { %s4091_s22 = scalar_lea.vmem %s270_s18, 1024  ;;  %p4099_p2 = scmp.lt.s32.totalorder %s270_s18, %s270_s18 }
  0x34   : > { %p4092_p12 = scmp.ne.s32.totalorder %s270_s18, %s4091_s22  ;;  %p4100_p4 = scmp.lt.s32.totalorder %s4091_s22, %s4091_s22 }
  0x36   : > { %p4094_p13 = pnand %p4092_p12, %p4596_p7  ;;  %p4101_p1 = por %p4100_p4, %p4099_p2 }
  0x38   : > { %p4095_p0 = pneg %p4094_p13 }
  0x3a   : > { %p4102_p3 = pnand %p4101_p1, %p4095_p0 }
  0x3c   : > { %4105 = shalt.err (!%p4102_p3)
}
  0x3d   : > { %s5681_s10 = smov 64   ;;  %s5683_s11 = smov 4  }
  0x3e   : > { %3680 = dma.hbm_to_vmem [thread:$0]  (!%p4582_p5), %s5723_s3, 1024, %s270_s18, [#allocation10], %s5681_s10, %s5681_s10, %s5683_s11  }
  0x3f   : > { %s5725_s5 = sld [smem:[#allocation41_spill]] }
  0x45   : > { %s4106_s2 = scalar_lea.hbm %s5725_s5, 9216 }
  0x46   : > { %p4107_p1 = scmp.ne.s32.totalorder %s5725_s5, %s4106_s2  ;;  %p4113_p8 = scmp.lt.u32.totalorder %s4106_s2, %s5725_s5 }
  0x48   : > { %p4109_p3 = pnand %p4107_p1, %p4596_p7 }
  0x4a   : > { %p4110_p6 = pneg %p4109_p3 }
  0x4c   : > { %p4115_p9 = pnand %p4113_p8, %p4110_p6 }
  0x4e   : > { %4118 = shalt.err (!%p4115_p9)
}
  0x4f   : > { %s4119_s18 = scalar_lea.vmem %s4586_s21, 9216  ;;  %p4127_p13 = scmp.lt.s32.totalorder %s4586_s21, %s4586_s21 }
  0x50   : > { %p4120_p10 = scmp.ne.s32.totalorder %s4586_s21, %s4119_s18  ;;  %p4128_p0 = scmp.lt.s32.totalorder %s4119_s18, %s4119_s18 }
  0x52   : > { %p4122_p11 = pnand %p4120_p10, %p4596_p7  ;;  %p4129_p2 = por %p4128_p0, %p4127_p13 }
  0x54   : > { %p4123_p12 = pneg %p4122_p11 }
  0x56   : > { %p4130_p4 = pnand %p4129_p2, %p4123_p12 }
  0x58   : > { %4133 = shalt.err (!%p4130_p4)
}
  0x59   : > { %3686 = dma.hbm_to_vmem [thread:$0]  (!%p4582_p5), %s5725_s5, 9216, %s4586_s21, [#allocation13], %s5681_s10, %s5681_s10, %s5683_s11  }
  0x5a   : > { %s37_s25 = sadd.s32 1, %s4434_s12  ;;  %s40_s26 = sadd.s32 1, %s4438_s13 }
  0x5b   : > { %p38_p1 = scmp.ge.s32.totalorder %s37_s25, 2  ;;  %p5695_p3 = scmp.eq.s32.totalorder %s4442_s14, 0 }
  0x5c   : > { %s2958_s7 = sshll.u32 %s4434_s12, 3  ;;  %s85_s16 = sadd.s32 1, %s4410_s29 }
  0x5d   : > { %s5808_s25 = smov (%p38_p1, %s37_s25), 0  ;;  %s5810_s26 = smov (!%p38_p1, %s40_s26), %s4438_s13 }
  0x5e   : > { %5726 = sst [smem:[#allocation31_spill]] %s5808_s25  ;;  %s45_s23 = ssub.s32 %s4434_s12, %s5808_s25 }
  0x5f   : > { %s2959_s20 = sadd.s32 4294967295, %s2958_s7  ;;  %p42_p6 = scmp.ge.s32.totalorder %s5810_s26, 2 }
  0x60   : > { %p74_p8 = scmp.gt.s32.totalorder %s2959_s20, 0  ;;  %s2960_s21 = sshll.u32 %s5808_s25, 3 }
  0x61   : > { %p92_p9 = scmp.ne.s32.totalorder %s4410_s29, %s4406_s28  ;;  %s5812_s26 = smov (%p42_p6, %s5810_s26), 0 }
  0x62   : > { %5727 = sst [smem:[#allocation32_spill]] %s5812_s26  ;;  %s5814_s20 = smov (!%p74_p8, %s2959_s20), 0 }
  0x63   : > { %s4658_s22 = ssub.s32 %s4438_s13, %s5812_s26  ;;  %s2961_s18 = sadd.s32 4294967295, %s2960_s21 }
  0x64   : > { %5728 = sst [smem:[#allocation33_spill]] %s4658_s22  ;;  %s4661_s2 = sor.u32 %s45_s23, %s4658_s22 }
  0x65   : > { %p78_p10 = scmp.gt.s32.totalorder %s2961_s18, 0  ;;  %p4666_p12 = por %p92_p9, %p5695_p3 }
  0x66   : > { %p98_p13 = scmp.ne.s32.totalorder %s4406_s28, %s4402_s27  ;;  %s4672_s10 = sadd.s32 8, %s2958_s7 }
  0x67   : > { %s5816_s18 = smov (!%p78_p10, %s2961_s18), 0  ;;  %5730 = sst [smem:[#allocation34_spill]] %s4672_s10 }
  0x68   : > { %s81_s11 = ssub.s32 %s5814_s20, %s5816_s18  ;;  %p5731_p2 = scmp.eq.s32.totalorder %s4569_s15, 0 }
  0x69   : > { %s82_s23 = sor.u32 %s81_s11, %s4658_s22  ;;  %s4682_s5 = sadd.s32 8, %s2960_s21 }
  0x6a   : > { %p4678_p4 = por %p98_p13, %p5731_p2  ;;  %p83_p1 = scmp.eq.s32.totalorder %s82_s23, 0 }
  0x6b   : > { %p5694_p8 = scmp.lt.s32.totalorder %s4442_s14, 4  ;;  %s4690_s7 = sshll.u32 %s4438_s13, 5 }
  0x6c   : > { %s5732_s3 = scalar_select %p4678_p4, 1, 0 }
  0x6d   : > { %s4687_s27 = scalar_select %p83_p1, %s4410_s29, %s85_s16  }
  0x6e   : > { %5733 = sst [smem:[#allocation35_spill]] %s5732_s3  ;;  %s342_s18 = sand.u32 1, %s4442_s14  }
  0x6f   : > { %s344_s11 = sand.u32 1, %s4410_s29   ;;  %s2978_s25 = sshll.u32 %s5814_s20, 1 }
  0x70   : > { %s2975_s26 = sshll.u32 %s344_s11, 3  ;;  %s356_s28 = sadd.s32 %s2978_s25, %s4690_s7 }
  0x71   : > { %s2980_s22 = sshll.u32 %s356_s28, 6  ;;  %s346_s3 = scalar_lea.vmem [#allocation6], %s2975_s26 }
  0x72   : > { %s359_s23 = sshll.u32 %s346_s3, 4  ;;  %s5734_s1 = sld [smem:[#allocation37_spill]]  ;;  %s4700_s23 = int_to_ptr.vmem [resolvable:$true] %s359_s23 }
  0x73   : > { %p4706_p9 = pnand %p5694_p8, %p4666_p12  ;;  %s4448_s3 = smov [#allocation11]  }
  0x74   : > { %s283_s28 = sshll.u32 %s4448_s3, 4  ;;  %s4712_s0 = scalar_lea.sflag [#allocation7], %s342_s18  ;;  %s4710_s28 = int_to_ptr.vmem [resolvable:$true] %s283_s28 }
  0x75   : > { %p4136_p13 = pneg %p4706_p9 }
  0x78   : > { %s4698_s21 = scalar_lea.hbm %s5734_s1, %s2980_s22  ;;  %s4139_s20 = scalar_lea.hbm %s5734_s1, 4096 }
  0x79   : > { %s4134_s10 = scalar_lea.hbm %s4698_s21, 128  ;;  %p4140_p12 = scmp.lt.u32.totalorder %s4698_s21, %s5734_s1 }
  0x7a   : > { %p4135_p10 = scmp.ne.s32.totalorder %s4698_s21, %s4134_s10  ;;  %p4141_p6 = scmp.lt.u32.totalorder %s4139_s20, %s4134_s10 }
  0x7b   : > { %p4143_p8 = scmp.lt.u32.totalorder %s4134_s10, %s4698_s21 }
  0x7c   : > { %p4137_p2 = pnand %p4136_p13, %p4135_p10  ;;  %p4142_p0 = por %p4141_p6, %p4140_p12 }
  0x7e   : > { %p4138_p1 = pneg %p4137_p2  ;;  %p4144_p3 = por %p4143_p8, %p4142_p0 }
  0x80   : > { %p4145_p11 = pnand %p4144_p3, %p4138_p1 }
  0x82   : > { %4148 = shalt.err (!%p4145_p11)
}
  0x83   : > { %s4149_s18 = scalar_lea.vmem %s4700_s23, 128  ;;  %s4449_s11 = smov [#allocation6]  }
  0x84   : > { %p4150_p10 = scmp.ne.s32.totalorder %s4700_s23, %s4149_s18  ;;  %s4154_s3 = sshll.u32 %s4449_s11, 4  ;;  %s4155_s3 = int_to_ptr.vmem [resolvable:$false] %s4154_s3 }
  0x85   : > { %s4156_s25 = scalar_lea.vmem %s4155_s3, 256  ;;  %p4157_p5 = scmp.lt.s32.totalorder %s4700_s23, %s4155_s3 }
  0x86   : > { %p4152_p2 = pnand %p4150_p10, %p4136_p13  ;;  %p4158_p6 = scmp.lt.s32.totalorder %s4156_s25, %s4149_s18 }
  0x88   : > { %p4153_p4 = pneg %p4152_p2  ;;  %p4159_p12 = por %p4158_p6, %p4157_p5 }
  0x8a   : > { %p4160_p0 = pnand %p4159_p12, %p4153_p4 }
  0x8c   : > { %4163 = shalt.err (!%p4160_p0)
}
  0x8d   : > { %s5736_s10 = smov 4   ;;  %s5737_s26 = smov 64  }
  0x8e   : > { %3696 = dma.hbm_to_vmem [thread:$0]  (!%p4706_p9), %s4698_s21, 128, %s4700_s23, %s4712_s0, %s5737_s26, %s5737_s26, %s5736_s10  }
  0x8f   : > { %s5738_s4 = sld [smem:[#allocation40_spill]] }
  0x95   : > { %s4164_s24 = scalar_lea.hbm %s5738_s4, 16 }
  0x96   : > { %p4165_p5 = scmp.ne.s32.totalorder %s5738_s4, %s4164_s24  ;;  %p4171_p4 = scmp.lt.u32.totalorder %s4164_s24, %s5738_s4 }
  0x98   : > { %p4167_p3 = pnand %p4165_p5, %p4596_p7 }
  0x9a   : > { %p4168_p11 = pneg %p4167_p3 }
  0x9c   : > { %p4173_p8 = pnand %p4171_p4, %p4168_p11 }
  0x9e   : > { %4176 = shalt.err (!%p4173_p8)
}
  0x9f   : > { %s4177_s23 = scalar_lea.vmem %s4710_s28, 16  ;;  %s4184_s21 = scalar_lea.vmem %s4710_s28, 32 }
  0xa0   : > { %p4178_p9 = scmp.ne.s32.totalorder %s4710_s28, %s4177_s23  ;;  %p4185_p10 = scmp.lt.s32.totalorder %s4710_s28, %s4710_s28 }
  0xa1   : > { %p4186_p2 = scmp.lt.s32.totalorder %s4184_s21, %s4177_s23 }
  0xa2   : > { %p4180_p13 = pnand %p4178_p9, %p4596_p7 }
  0xa3   : > { %p4187_p6 = por %p4186_p2, %p4185_p10 }
  0xa4   : > { %p4181_p1 = pneg %p4180_p13 }
  0xa6   : > { %p4188_p12 = pnand %p4187_p6, %p4181_p1 }
  0xa8   : > { %4191 = shalt.err (!%p4188_p12)
}
  0xa9   : > { %p5739_p0 = scmp.ne.s32.totalorder %s5722_s19, 0  ;;  %s4450_s22 = smov [#allocation14]  }
  0xaa   : > { %s307_s24 = sshll.u32 %s4450_s22, 4  ;;  %s5740_s6 = sld [smem:[#allocation42_spill]]  ;;  %s308_s24 = int_to_ptr.vmem [resolvable:$true] %s307_s24 }
  0xab   : > { %3683 = dma.hbm_to_vmem [thread:$0]  (!%p5739_p0), %s5738_s4, 16, %s4710_s28, [#allocation10]  }
  0xb0   : > { %s4192_s16 = scalar_lea.hbm %s5740_s6, 16 }
  0xb1   : > { %p4193_p5 = scmp.ne.s32.totalorder %s5740_s6, %s4192_s16  ;;  %p4199_p4 = scmp.lt.u32.totalorder %s4192_s16, %s5740_s6 }
  0xb3   : > { %p4195_p3 = pnand %p4193_p5, %p4596_p7 }
  0xb5   : > { %p4196_p11 = pneg %p4195_p3 }
  0xb7   : > { %p4201_p8 = pnand %p4199_p4, %p4196_p11 }
  0xb9   : > { %4204 = shalt.err (!%p4201_p8)
}
  0xba   : > { %s4205_s28 = scalar_lea.vmem %s308_s24, 16  ;;  %s4212_s25 = scalar_lea.vmem %s308_s24, 32 }
  0xbb   : > { %p4206_p9 = scmp.ne.s32.totalorder %s308_s24, %s4205_s28  ;;  %p4213_p10 = scmp.lt.s32.totalorder %s308_s24, %s308_s24 }
  0xbc   : > { %p4214_p2 = scmp.lt.s32.totalorder %s4212_s25, %s4205_s28 }
  0xbd   : > { %p4208_p13 = pnand %p4206_p9, %p4596_p7 }
  0xbe   : > { %p4215_p6 = por %p4214_p2, %p4213_p10 }
  0xbf   : > { %p4209_p1 = pneg %p4208_p13 }
  0xc1   : > { %p4216_p12 = pnand %p4215_p6, %p4209_p1 }
  0xc3   : > { %4219 = shalt.err (!%p4216_p12)
}
  0xc4   : > { %3689 = dma.hbm_to_vmem [thread:$0]  (!%p5739_p0), %s5740_s6, 16, %s308_s24, [#allocation13]  }
  0xc5   : > { %s2957_s1 = sadd.s32 4294967294, %s4442_s14   ;;  %s49_s19 = sadd.s32 1, %s4422_s9 }
  0xc6   : > { %p5741_p7 = scmp.eq.s32.totalorder %s4661_s2, 0  ;;  %p56_p5 = scmp.ne.s32.totalorder %s4422_s9, %s4418_s8 }
  0xc7   : > { %p62_p3 = scmp.ne.s32.totalorder %s4418_s8, %s4414_s30  ;;  %p244_p11 = scmp.eq.s32.totalorder %s4569_s15, 3 }
  0xc8   : > { %s4790_s17 = scalar_select %p5741_p7, %s4422_s9, %s49_s19  }
  0xc9   : > { %p250_p4 = scmp.eq.s32.totalorder %s2957_s1, 3  ;;  %p5742_p8 = scmp.eq.s32.totalorder %s4442_s14, 0 }
  0xca   : > { %p5744_p13 = scmp.eq.s32.totalorder %s4569_s15, 0  ;;  %p4809_p0 = por %p244_p11, %p56_p5 }
  0xcb   : > { %p4799_p9 = por %p5742_p8, %p56_p5  ;;  %p4813_p10 = por %p250_p4, %p62_p3 }
  0xcc   : > { %p4805_p1 = por %p5744_p13, %p62_p3  ;;  %s318_s16 = sand.u32 1, %s4422_s9  }
  0xcd   : > { %s5746_s2 = scalar_select %p4809_p0, 1, 0 }
  0xce   : > { %s5747_s24 = scalar_select %p4813_p10, 1, 0 }
  0xcf   : > { %s3116_s18 = sshll.u32 %s4434_s12, 4  ;;  %s2970_s23 = sshll.u32 %s318_s16, 6 }
  0xd0   : > { %s329_s21 = sadd.s32 %s3116_s18, %s4690_s7  ;;  %s322_s25 = scalar_lea.vmem [#allocation3], %s2970_s23 }
  0xd1   : > { %s2974_s28 = sshll.u32 %s329_s21, 6  ;;  %s332_s20 = sshll.u32 %s322_s25, 4  ;;  %s4825_s20 = int_to_ptr.vmem [resolvable:$true] %s332_s20 }
  0xd2   : > { %s5748_s19 = sld [smem:[#allocation36_spill]]  ;;  %p5749_p2 = scmp.lt.s32.totalorder %s4442_s14, 4 }
  0xd3   : > { %s4835_s18 = scalar_lea.sflag [#allocation4], %s318_s16 }
  0xd4   : > { %p4831_p6 = pnand %p5749_p2, %p4799_p9 }
  0xd6   : > { %p4222_p7 = pneg %p4831_p6 }
  0xd8   : > { %s4823_s4 = scalar_lea.hbm %s5748_s19, %s2974_s28  ;;  %s4225_s11 = scalar_lea.hbm %s5748_s19, 4096 }
  0xd9   : > { %s4220_s23 = scalar_lea.hbm %s4823_s4, 1024  ;;  %p4226_p11 = scmp.lt.u32.totalorder %s4823_s4, %s5748_s19 }
  0xda   : > { %p4221_p12 = scmp.ne.s32.totalorder %s4823_s4, %s4220_s23  ;;  %p4227_p4 = scmp.lt.u32.totalorder %s4225_s11, %s4220_s23 }
  0xdb   : > { %p4229_p9 = scmp.lt.u32.totalorder %s4220_s23, %s4823_s4 }
  0xdc   : > { %p4223_p5 = pnand %p4222_p7, %p4221_p12  ;;  %p4228_p8 = por %p4227_p4, %p4226_p11 }
  0xde   : > { %p4224_p3 = pneg %p4223_p5  ;;  %p4230_p13 = por %p4229_p9, %p4228_p8 }
  0xe0   : > { %p4231_p2 = pnand %p4230_p13, %p4224_p3 }
  0xe2   : > { %4234 = shalt.err (!%p4231_p2)
}
  0xe3   : > { %s4235_s16 = scalar_lea.vmem %s4825_s20, 1024  ;;  %s4451_s1 = smov [#allocation3]  }
  0xe4   : > { %p4236_p12 = scmp.ne.s32.totalorder %s4825_s20, %s4235_s16  ;;  %s4240_s21 = sshll.u32 %s4451_s1, 4  ;;  %s4241_s21 = int_to_ptr.vmem [resolvable:$false] %s4240_s21 }
  0xe5   : > { %s4242_s28 = scalar_lea.vmem %s4241_s21, 2048  ;;  %p4243_p0 = scmp.lt.s32.totalorder %s4825_s20, %s4241_s21 }
  0xe6   : > { %p4238_p5 = pnand %p4236_p12, %p4222_p7  ;;  %p4244_p11 = scmp.lt.s32.totalorder %s4242_s28, %s4235_s16 }
  0xe8   : > { %p4239_p10 = pneg %p4238_p5  ;;  %p4245_p4 = por %p4244_p11, %p4243_p0 }
  0xea   : > { %p4246_p8 = pnand %p4245_p4, %p4239_p10 }
  0xec   : > { %4249 = shalt.err (!%p4246_p8)
}
  0xed   : > { %s5751_s23 = sld [smem:[#allocation34_spill]]  ;;  %s5752_s11 = sld [smem:[#allocation24_spill]] }
  0xee   : > { %s5753_s25 = sld [smem:[#allocation23_spill]]  ;;  %s5754_s22 = sld [smem:[#allocation22_spill]] }
  0xef   : > { %s5755_s16 = sld [smem:[#allocation33_spill]]  ;;  %p5757_p10 = scmp.lt.s32.totalorder %s4682_s5, 15 }
  0xf0   : > { %3693 = dma.hbm_to_vmem [thread:$0]  (!%p4831_p6), %s4823_s4, 1024, %s4825_s20, %s4835_s18, %s5737_s26, %s5737_s26, %s5736_s10  }
  0xf1   : > { %s5820_s5 = smov (!%p5757_p10, %s4682_s5), 15  ;;  %p5758_p9 = scmp.eq.s32.totalorder %s4442_s14, 0 }
  0xf2   : > { %p5760_p12 = scmp.eq.s32.totalorder %s4569_s15, 0  ;;  %p5763_p6 = scmp.lt.s32.totalorder %s4442_s14, 4 }
  0xf3   : > { %p5756_p0 = scmp.lt.s32.totalorder %s5751_s23, 15  ;;  %s121_s6 = sadd.s32 1, %s5752_s11 }
  0xf4   : > { %p128_p7 = scmp.ne.s32.totalorder %s5752_s11, %s5753_s25  ;;  %p134_p3 = scmp.ne.s32.totalorder %s5753_s25, %s5754_s22 }
  0xf5   : > { %s5818_s23 = smov (!%p5756_p0, %s5751_s23), 15  ;;  %s371_s20 = sand.u32 1, %s5752_s11  }
  0xf6   : > { %s117_s1 = ssub.s32 %s5818_s23, %s5820_s5  ;;  %p4880_p13 = por %p128_p7, %p5758_p9 }
  0xf7   : > { %s118_s21 = sor.u32 %s117_s1, %s5755_s16  ;;  %p4886_p5 = por %p134_p3, %p5760_p12 }
  0xf8   : > { %p119_p2 = scmp.eq.s32.totalorder %s118_s21, 0  ;;  %s2983_s18 = sshll.u32 %s5818_s23, 1 }
  0xf9   : > { %s5761_s4 = scalar_select %p4886_p5, 1, 0 }
  0xfa   : > { %s5822_s11 = smov (!%p119_p2, %s5752_s11), %s121_s6  ;;  %s2981_s5 = sshll.u32 %s371_s20, 3 }
  0xfb   : > { %s383_s19 = sadd.s32 %s2983_s18, %s4690_s7  ;;  %s5762_s1 = sld [smem:[#allocation38_spill]] }
  0xfc   : > { %s2985_s25 = sshll.u32 %s383_s19, 6  ;;  %s373_s21 = scalar_lea.vmem [#allocation8], %s2981_s5 }
  0xfd   : > { %s386_s12 = sshll.u32 %s373_s21, 4  ;;  %p4906_p11 = pnand %p5763_p6, %p4880_p13  ;;  %s4900_s12 = int_to_ptr.vmem [resolvable:$true] %s386_s12 }
  0xff   : > { %p4252_p8 = pneg %p4906_p11 }
 0x101   : > { %s4898_s13 = scalar_lea.hbm %s5762_s1, %s2985_s25  ;;  %s4255_s20 = scalar_lea.hbm %s5762_s1, 4096 }
 0x102   : > { %s4250_s7 = scalar_lea.hbm %s4898_s13, 128  ;;  %p4256_p7 = scmp.lt.u32.totalorder %s4898_s13, %s5762_s1 }
 0x103   : > { %p4251_p4 = scmp.ne.s32.totalorder %s4898_s13, %s4250_s7  ;;  %p4257_p3 = scmp.lt.u32.totalorder %s4255_s20, %s4250_s7 }
 0x104   : > { %p4259_p13 = scmp.lt.u32.totalorder %s4250_s7, %s4898_s13 }
 0x105   : > { %p4253_p0 = pnand %p4252_p8, %p4251_p4  ;;  %p4258_p9 = por %p4257_p3, %p4256_p7 }
 0x107   : > { %p4254_p10 = pneg %p4253_p0  ;;  %p4260_p2 = por %p4259_p13, %p4258_p9 }
 0x109   : > { %p4261_p12 = pnand %p4260_p2, %p4254_p10 }
 0x10b   : > { %4264 = shalt.err (!%p4261_p12)
}
 0x10c   : > { %s4265_s5 = scalar_lea.vmem %s4900_s12, 128  ;;  %s4452_s25 = smov [#allocation8]  }
 0x10d   : > { %p4266_p6 = scmp.ne.s32.totalorder %s4900_s12, %s4265_s5  ;;  %s4270_s22 = sshll.u32 %s4452_s25, 4  ;;  %s4271_s22 = int_to_ptr.vmem [resolvable:$false] %s4270_s22 }
 0x10e   : > { %s4272_s16 = scalar_lea.vmem %s4271_s22, 256  ;;  %p4273_p5 = scmp.lt.s32.totalorder %s4900_s12, %s4271_s22 }
 0x10f   : > { %p4268_p4 = pnand %p4266_p6, %p4252_p8  ;;  %p4274_p7 = scmp.lt.s32.totalorder %s4272_s16, %s4265_s5 }
 0x111   : > { %p4269_p0 = pneg %p4268_p4  ;;  %p4275_p3 = por %p4274_p7, %p4273_p5 }
 0x113   : > { %p4276_p9 = pnand %p4275_p3, %p4269_p0 }
 0x115   : > { %4279 = shalt.err (!%p4276_p9)
}
 0x116   : > { %3699 = dma.hbm_to_vmem [thread:$0]  (!%p4906_p11), %s4898_s13, 128, %s4900_s12, %s4712_s0, %s5737_s26, %s5737_s26, %s5736_s10  }
 0x117   : > { %s5765_s21 = sld [smem:[#allocation30_spill]] }
 0x11d   : > { %p5766_p8 = scmp.ne.s32.totalorder %s5765_s21, 0 }
 0x11e   : > { %s4942_s7 = sand.u32 (!%p5766_p8), 1, %s4418_s8  }
 0x11f   : > { %398 = sbr.rel (%p5766_p8) target bundleno = 1177 (0x499), region = 48  ;;  %s2987_s19 = sshll.u32 (!%p5766_p8), %s4942_s7, 6 }
 0x120   : > { %s401_s6 = scalar_lea.sflag (!%p5766_p8), [#allocation4], %s4942_s7  ;;  %s4948_s23 = scalar_lea.vmem (!%p5766_p8), [#allocation3], %s2987_s19 }
 0x126   : > { %4365 = dma.done.wait (%p4805_p1), %s401_s6, 1024  }
 0x127   : > { %4367 = vsyncadd (%p4805_p1), %s401_s6, 4294966272  ;;  %s5767_s12 = sld [smem:[#allocation25_spill]]  ;;  %s5768_s13 = sld [smem:[#allocation35_spill]] }
 0x128   : > { %s409_s0 = sand.u32 1, %s4569_s15  }
 0x129   : > { %s410_s20 = scalar_lea.sflag [#allocation7], %s409_s0 }
 0x12d   : > { %s411_s10 = sand.u32 1, %s5767_s12   ;;  %p5769_p5 = scmp.ne.s32.totalorder %s5768_s13, 0 }
 0x12e   : > { %s2988_s26 = sshll.u32 %s411_s10, 3 }
 0x12f   : > { %s413_s28 = scalar_lea.vmem [#allocation6], %s2988_s26 }
 0x130   : > { %4369 = dma.done.wait (%p5769_p5), %s410_s20, 128  }
 0x131   : > { %4371 = vsyncadd (%p5769_p5), %s410_s20, 4294967168  ;;  %s5770_s18 = sld [smem:[#allocation23_spill]]  ;;  %p5771_p1 = scmp.ne.s32.totalorder %s5761_s4, 0 }
 0x137   : > { %s420_s5 = sand.u32 1, %s5770_s18  }
 0x138   : > { %s4961_s25 = sshll.u32 %s420_s5, 3 }
 0x139   : > { %s422_s3 = scalar_lea.vmem [#allocation8], %s4961_s25 }
 0x13a   : > { %4373 = dma.done.wait (%p5771_p1), %s410_s20, 128  }
 0x13b   : > { %4375 = vsyncadd (%p5771_p1), %s410_s20, 4294967168  ;;  %p5772_p11 = scmp.eq.s32.totalorder %s4569_s15, 0 }
 0x13d   : > { %4377 = dma.done.wait (%p5772_p11), [#allocation10], 1040   ;;  %p5773_p10 = pmov %p5772_p11 }
 0x13f   : > { %4379 = vsyncadd (%p5773_p10), [#allocation10], 4294966256  ;;  %p5774_p13 = pmov %p5773_p10 }
 0x140   : > { %p5775_p2 = pmov %p5773_p10 }
 0x141   : > { %4381 = dma.done.wait (%p5774_p13), [#allocation13], 9232  }
 0x142   : > { %4383 = vsyncadd (%p5775_p2), [#allocation13], 4294958064  ;;  %v3836_v0 = vld [vmem:[#allocation9] sm:$0xff]   ;;  %v3837_v1 = vld [vmem:[#allocation9 + $0x8] sm:$0xff]   ;;  %vm1084_vm3 = vcmask 1040384   ;;  %vm1147_vm6 = vcmask 1047552  }
 0x143   : > { %3441 = vmatprep.subr.bf16.mxu1 %v3836_v0  ;;  %v3838_v2 = vld [vmem:[#allocation9 + $0x10] sm:$0xff]   ;;  %v3839_v3 = vld [vmem:[#allocation9 + $0x18] sm:$0xff]   ;;  %v3844_v4 = vld [vmem:[%s413_s28] sm:$0xff]   ;;  %vm1085_vm4 = vsmask.f32 256  ;;  %s5215_s15 = scalar_lea.vmem [#allocation15], %s2987_s19 }
 0x144   : > { %3442 = vmatpush3.bf16.msra.mxu1 %v3836_v0  ;;  %3457 = vmatprep.mubr.bf16.mxu1 %v3844_v4  ;;  %v3840_v5 = vld [vmem:[#allocation9 + $0x20] sm:$0xff]   ;;  %v3841_v6 = vld [vmem:[#allocation9 + $0x28] sm:$0xff]   ;;  %v3842_v7 = vld [vmem:[#allocation9 + $0x30] sm:$0xff]   ;;  %vm1148_vm7 = vsmask.f32 7424  ;;  %s5780_s4 = sld [smem:[#allocation26_spill]] }
 0x145   : > { %3443 = vmatprep.subr.bf16.mxu1 %v3837_v1  ;;  %v3843_v8 = vld [vmem:[#allocation9 + $0x38] sm:$0xff]   ;;  %v4977_v9 = vld [vmem:[%s4948_s23] sm:$0xff]   ;;  %v4980_v10 = vld [vmem:[%s4948_s23 + $0x8] sm:$0xff]  }
 0x146   : > { %v4985_v11 = vld [vmem:[%s4948_s23 + $0x10] sm:$0xff]   ;;  %v4988_v12 = vld [vmem:[%s4948_s23 + $0x18] sm:$0xff]   ;;  %v4993_v13 = vld [vmem:[%s4948_s23 + $0x20] sm:$0xff]  }
 0x147   : > { %v4996_v14 = vld [vmem:[%s4948_s23 + $0x28] sm:$0xff]   ;;  %v5001_v15 = vld [vmem:[%s4948_s23 + $0x30] sm:$0xff]   ;;  %v5004_v16 = vld [vmem:[%s4948_s23 + $0x38] sm:$0xff]  }
 0x148   : > { %3444 = vmatpush3.bf16.msra.mxu1 %v3837_v1  ;;  %v3853_v17 = vld [vmem:[%s422_s3] sm:$0xff]   ;;  %v5010_v18 = vld [vmem:[#allocation11] ss:$0 sm:$0xff]  ;;  %vm5109_vm12 = vmand %vm1084_vm3, %vm1085_vm4 }
 0x149   : > { %3445 = vmatprep.subr.bf16.mxu1 %v3838_v2  ;;  %vm5116_vm13 = vmand %vm1147_vm6, %vm1148_vm7 }
 0x14a   : > { %p3014_p12 = scmp.ne.s32.totalorder %s5780_s4, 0 }
 0x14c   : > { %3446 = vmatpush3.bf16.msra.mxu1 %v3838_v2 }
 0x14d   : > { %3447 = vmatprep.subr.bf16.mxu1 %v3839_v3 }
 0x150   : > { %3448 = vmatpush3.bf16.msra.mxu1 %v3839_v3 }
 0x151   : > { %3449 = vmatprep.subr.bf16.mxu1 %v3840_v5 }
 0x154   : > { %3450 = vmatpush3.bf16.msra.mxu1 %v3840_v5 }
 0x155   : > { %3451 = vmatprep.subr.bf16.mxu1 %v3841_v6 }
 0x158   : > { %3452 = vmatpush3.bf16.msra.mxu1 %v3841_v6 }
 0x159   : > { %3453 = vmatprep.subr.bf16.mxu1 %v3842_v7 }
 0x15c   : > { %3454 = vmatpush3.bf16.msra.mxu1 %v3842_v7 }
 0x15d   : > { %3455 = vmatprep.subr.bf16.mxu1 %v3843_v8 }
 0x160   : > { %3456 = vmatpush3.bf16.msra.mxu1 %v3843_v8 }
 0x163   : > { %3458 = vmatmul.mubr.bf16.vlgmr.msra.gmra.mrb[0].mxu1 %v4977_v9 }
 0x164   : > { %3461 = vmatprep.mubr.bf16.mxu1 %v4980_v10 }
 0x16b   : > { %3462 = vmatmul.mubr.bf16.gmra.mrb[4].mxu1 %v4985_v11 }
 0x16c   : > { %3465 = vmatprep.mubr.bf16.mxu1 %v4988_v12 }
 0x173   : > { %3466 = vmatmul.mubr.bf16.gmra.mrb[8].mxu1 %v4993_v13 }
 0x174   : > { %3469 = vmatprep.mubr.bf16.mxu1 %v4996_v14 }
 0x17b   : > { %3470 = vmatmul.mubr.bf16.gmra.mrb[12].mxu1 %v5001_v15 }
 0x17c   : > { %3473 = vmatprep.mubr.bf16.mxu1 %v5004_v16 }
 0x183   : > { %3474 = vmatmul.mubr.bf16.gmra.mrb[16].mxu1 %v3853_v17 }
 0x236   : > { %v3459_v19 = vpop.f32.mrb[0].mxu1 }
 0x237   : > { %v5013_v20 = vadd.f32 %v3459_v19, %v5010_v18  ;;  %v675_v21 = vpop.f32.mrb[1].mxu1 }
 0x238   : > { %v5016_v22 = vadd.f32 %v5010_v18, %v675_v21  ;;  %v3460_v23 = vpop.f32.mrb[2].mxu1 }
 0x239   : > { %v756_v24 = vmin.f32 %v5013_v20, 20.0  ;;  %v5020_v25 = vadd.f32 %v3460_v23, %v5010_v18  ;;  %v678_v26 = vpop.f32.mrb[3].mxu1  ;;  %vm936_vm0 = vcmp.gt.f32.partialorder %v5013_v20, 20.0 }
 0x23a   : > { %v754_v27 = vmin.f32 %v5016_v22, 20.0  ;;  %v5024_v28 = vadd.f32 %v5010_v18, %v678_v26  ;;  %vm934_vm1 = vcmp.gt.f32.partialorder %v5016_v22, 20.0 }
 0x23b   : > { %v778_v29 = vmul.f32 1.442695, %v756_v24  ;;  %v757_v30 = vmin.f32 %v5020_v25, 20.0  ;;  %vm937_vm2 = vcmp.gt.f32.partialorder %v5020_v25, 20.0 }
 0x23c   : > { %v774_v31 = vmul.f32 1.442695, %v754_v27  ;;  %v755_v32 = vmin.f32 %v5024_v28, 20.0  ;;  %vm935_vm5 = vcmp.gt.f32.partialorder %v5024_v28, 20.0 }
 0x23d   : > { %3862 = vpow2.f32 %v778_v29  ;;  %v780_v33 = vmul.f32 1.442695, %v757_v30 }
 0x23e   : > { %3864 = vpow2.f32 %v774_v31  ;;  %v776_v34 = vmul.f32 1.442695, %v755_v32  ;;  %v3463_v35 = vpop.f32.mrb[4].mxu1 }
 0x23f   : > { %3866 = vpow2.f32 %v780_v33  ;;  %v5029_v36 = vadd.f32 %v3463_v35, %v5010_v18  ;;  %v691_v37 = vpop.f32.mrb[5].mxu1 }
 0x240   : > { %3868 = vpow2.f32 %v776_v34  ;;  %v5032_v38 = vadd.f32 %v5010_v18, %v691_v37  ;;  %v3464_v39 = vpop.f32.mrb[6].mxu1 }
 0x241   : > { %v760_v40 = vmin.f32 %v5029_v36, 20.0  ;;  %v5036_v41 = vadd.f32 %v3464_v39, %v5010_v18  ;;  %v694_v42 = vpop.f32.mrb[7].mxu1  ;;  %vm940_vm8 = vcmp.gt.f32.partialorder %v5029_v36, 20.0 }
 0x242   : > { %v758_v43 = vmin.f32 %v5032_v38, 20.0  ;;  %v5040_v44 = vadd.f32 %v5010_v18, %v694_v42  ;;  %vm938_vm9 = vcmp.gt.f32.partialorder %v5032_v38, 20.0 }
 0x243   : > { %v786_v45 = vmul.f32 1.442695, %v760_v40  ;;  %v761_v46 = vmin.f32 %v5036_v41, 20.0  ;;  %vm941_vm10 = vcmp.gt.f32.partialorder %v5036_v41, 20.0 }
 0x244   : > { %v782_v47 = vmul.f32 1.442695, %v758_v43  ;;  %v759_v48 = vmin.f32 %v5040_v44, 20.0  ;;  %vm939_vm11 = vcmp.gt.f32.partialorder %v5040_v44, 20.0 }
 0x245   : > { %3870 = vpow2.f32 %v786_v45  ;;  %v788_v49 = vmul.f32 1.442695, %v761_v46 }
 0x246   : > { %3872 = vpow2.f32 %v782_v47  ;;  %v784_v50 = vmul.f32 1.442695, %v759_v48  ;;  %v3467_v51 = vpop.f32.mrb[8].mxu1 }
 0x247   : > { %v3863_v52 = vpop.eup %3862  ;;  %3874 = vpow2.f32 %v788_v49  ;;  %v5045_v53 = vadd.f32 %v3467_v51, %v5010_v18  ;;  %v707_v54 = vpop.f32.mrb[9].mxu1 }
 0x248   : > { %v3865_v55 = vpop.eup %3864  ;;  %v816_v56 = vadd.f32 2.0, %v3863_v52  ;;  %3876 = vpow2.f32 %v784_v50  ;;  %v5048_v57 = vadd.f32 %v5010_v18, %v707_v54  ;;  %v3468_v58 = vpop.f32.mrb[10].mxu1 }
 0x249   : > { %v3867_v59 = vpop.eup %3866  ;;  %v814_v60 = vadd.f32 2.0, %v3865_v55  ;;  %v764_v61 = vmin.f32 %v5045_v53, 20.0  ;;  %v5052_v62 = vadd.f32 %v3468_v58, %v5010_v18  ;;  %v710_v63 = vpop.f32.mrb[11].mxu1  ;;  %vm944_vm14 = vcmp.gt.f32.partialorder %v5045_v53, 20.0 }
 0x24a   : > { %v3869_v0 = vpop.eup %3868  ;;  %v836_v1 = vmul.f32 %v3863_v52, %v816_v56  ;;  %v817_v2 = vadd.f32 2.0, %v3867_v59  ;;  %v762_v3 = vmin.f32 %v5048_v57, 20.0  ;;  %v5057_v26 = vadd.f32 %v5010_v18, %v710_v63 }
 0x24b   : > { %v834_v4 = vmul.f32 %v3865_v55, %v814_v60  ;;  %v815_v5 = vadd.f32 2.0, %v3869_v0  ;;  %v794_v6 = vmul.f32 1.442695, %v764_v61  ;;  %v765_v7 = vmin.f32 %v5052_v62, 20.0 }
 0x24c   : > { %v856_v8 = vadd.f32 2.0, %v836_v1  ;;  %v837_v17 = vmul.f32 %v3867_v59, %v817_v2  ;;  %v790_v24 = vmul.f32 1.442695, %v762_v3  ;;  %v763_v37 = vmin.f32 %v5057_v26, 20.0 }
 0x24d   : > { %v854_v19 = vadd.f32 2.0, %v834_v4  ;;  %v835_v21 = vmul.f32 %v3869_v0, %v815_v5  ;;  %3878 = vpow2.f32 %v794_v6  ;;  %v796_v31 = vmul.f32 1.442695, %v765_v7 }
 0x24e   : > { %3880 = vrcp.f32 %v856_v8  ;;  %v857_v23 = vadd.f32 2.0, %v837_v17  ;;  %v3471_v27 = vpop.f32.mrb[12].mxu1  ;;  %v792_v49 = vmul.f32 1.442695, %v763_v37  ;;  %vm942_vm15 = vcmp.gt.f32.partialorder %v5048_v57, 20.0 }
 0x24f   : > { %v3871_v29 = vpop.eup %3870  ;;  %3882 = vrcp.f32 %v854_v19  ;;  %v855_v30 = vadd.f32 2.0, %v835_v21  ;;  %v5060_v32 = vadd.f32 %v3471_v27, %v5010_v18  ;;  %v723_v33 = vpop.f32.mrb[13].mxu1 }
 0x250   : > { %v3873_v34 = vpop.eup %3872  ;;  %3884 = vrcp.f32 %v857_v23  ;;  %v820_v35 = vadd.f32 2.0, %v3871_v29  ;;  %v3472_v39 = vpop.f32.mrb[14].mxu1  ;;  %v5065_v56 = vadd.f32 %v5010_v18, %v723_v33 }
 0x251   : > { %v3875_v40 = vpop.eup %3874  ;;  %3886 = vrcp.f32 %v855_v30  ;;  %v818_v42 = vadd.f32 2.0, %v3873_v34  ;;  %v768_v43 = vmin.f32 %v5060_v32, 20.0  ;;  %v726_v45 = vpop.f32.mrb[15].mxu1  ;;  %v5068_v60 = vadd.f32 %v3472_v39, %v5010_v18 }
 0x252   : > { %v3877_v46 = vpop.eup %3876  ;;  %v840_v47 = vmul.f32 %v3871_v29, %v820_v35  ;;  %v821_v48 = vadd.f32 2.0, %v3875_v40  ;;  %3888 = vpow2.f32 %v790_v24  ;;  %v766_v63 = vmin.f32 %v5065_v56, 20.0 }
 0x253   : > { %v838_v50 = vmul.f32 %v3873_v34, %v818_v42  ;;  %v819_v51 = vadd.f32 2.0, %v3877_v46  ;;  %3890 = vpow2.f32 %v796_v31  ;;  %v802_v52 = vmul.f32 1.442695, %v768_v43 }
 0x254   : > { %v860_v54 = vadd.f32 2.0, %v840_v47  ;;  %v841_v55 = vmul.f32 %v3875_v40, %v821_v48  ;;  %3892 = vpow2.f32 %v792_v49  ;;  %v769_v3 = vmin.f32 %v5068_v60, 20.0 }
 0x255   : > { %v858_v58 = vadd.f32 2.0, %v838_v50  ;;  %v839_v59 = vmul.f32 %v3877_v46, %v819_v51  ;;  %3894 = vpow2.f32 %v802_v52  ;;  %v798_v19 = vmul.f32 1.442695, %v766_v63 }
 0x256   : > { %3896 = vrcp.f32 %v860_v54  ;;  %v861_v61 = vadd.f32 2.0, %v841_v55  ;;  %v3475_v0 = vpop.f32.mrb[16].mxu1  ;;  %v804_v29 = vmul.f32 1.442695, %v769_v3  ;;  %v5081_v30 = vadd.f32 %v5010_v18, %v726_v45 }
 0x257   : > { %v3879_v1 = vpop.eup %3878  ;;  %3898 = vrcp.f32 %v858_v58  ;;  %v859_v2 = vadd.f32 2.0, %v839_v59  ;;  %v5072_v4 = vpop.f32.mrb[17].mxu1  ;;  %v5087_v42 = vadd.f32 %v3475_v0, %v5010_v18  ;;  %vm949_vm3 = vcmp.gt.f32.partialorder %v5068_v60, 20.0 }
 0x258   : > { %v3881_v5 = vpop.eup %3880  ;;  %3900 = vrcp.f32 %v861_v61  ;;  %v824_v6 = vadd.f32 2.0, %v3879_v1  ;;  %v5075_v7 = vpop.f32.mrb[18].mxu1  ;;  %v767_v51 = vmin.f32 %v5081_v30, 20.0  ;;  %vm946_vm4 = vcmp.gt.f32.partialorder %v5065_v56, 20.0 }
 0x259   : > { %v3883_v8 = vpop.eup %3882  ;;  %v896_v17 = vmul.f32 2.0, %v3881_v5  ;;  %3902 = vrcp.f32 %v859_v2  ;;  %v5078_v21 = vpop.f32.mrb[19].mxu1  ;;  %vm952_vm6 = vcmp.gt.f32.partialorder %v5087_v42, 20.0 }
 0x25a   : > { %v3885_v23 = vpop.eup %3884  ;;  %v894_v24 = vmul.f32 2.0, %v3883_v8  ;;  %v844_v27 = vmul.f32 %v3879_v1, %v824_v6  ;;  %3904 = vpow2.f32 %v798_v19 }
 0x25b   : > { %v3887_v31 = vpop.eup %3886  ;;  %v916_v33 = vsub.f32 1.0, %v896_v17  ;;  %v897_v34 = vmul.f32 2.0, %v3885_v23  ;;  %3906 = vpow2.f32 %v804_v29 }
 0x25c   : > { %v3889_v35 = vpop.eup %3888  ;;  %v914_v37 = vsub.f32 1.0, %v894_v24  ;;  %v895_v39 = vmul.f32 2.0, %v3887_v31  ;;  %v864_v40 = vadd.f32 2.0, %v844_v27 }
 0x25d   : > { %v3891_v43 = vpop.eup %3890  ;;  %v956_v45 = vsel %vm936_vm0, 1.0, %v916_v33  ;;  %v917_v46 = vsub.f32 1.0, %v897_v34  ;;  %v822_v47 = vadd.f32 2.0, %v3889_v35  ;;  %vm945_vm0 = vcmp.gt.f32.partialorder %v5052_v62, 20.0 }
 0x25e   : > { %v3893_v48 = vpop.eup %3892  ;;  %v954_v49 = vsel %vm934_vm1, 1.0, %v914_v37  ;;  %v915_v50 = vsub.f32 1.0, %v895_v39  ;;  %v976_v54 = vmul.f32 %v956_v45, %v5013_v20  ;;  %v825_v59 = vadd.f32 2.0, %v3891_v43 }
 0x25f   : > { %v3895_v52 = vpop.eup %3894  ;;  %v957_v55 = vsel %vm937_vm2, 1.0, %v917_v46  ;;  %v842_v58 = vmul.f32 %v3889_v35, %v822_v47  ;;  %3908 = vrcp.f32 %v864_v40  ;;  %v823_v1 = vadd.f32 2.0, %v3893_v48 }
 0x260   : > { %v3897_v61 = vpop.eup %3896  ;;  %v977_v63 = vmul.f32 %v957_v55, %v5020_v25  ;;  %v955_v0 = vsel %vm935_vm5, 1.0, %v915_v50  ;;  %v974_v3 = vmul.f32 %v954_v49, %v5016_v22  ;;  %v828_v20 = vadd.f32 2.0, %v3895_v52 }
 0x261   : > { %v3899_v2 = vpop.eup %3898  ;;  %v975_v5 = vmul.f32 %v955_v0, %v5024_v28  ;;  %v900_v6 = vmul.f32 2.0, %v3897_v61  ;;  %v862_v23 = vadd.f32 2.0, %v842_v58  ;;  %v845_v24 = vmul.f32 %v3891_v43, %v825_v59 }
 0x262   : > { %v3901_v8 = vpop.eup %3900  ;;  %v995_v17 = vpack.c.bf16 %v977_v63, %v976_v54  ;;  %v898_v19 = vmul.f32 2.0, %v3899_v2  ;;  %v843_v33 = vmul.f32 %v3893_v48, %v823_v1  ;;  %vm943_vm1 = vcmp.gt.f32.partialorder %v5057_v26, 20.0 }
 0x263   : > { %v3903_v25 = vpop.eup %3902  ;;  %v994_v27 = vpack.c.bf16 %v975_v5, %v974_v3  ;;  %v920_v29 = vsub.f32 1.0, %v900_v6  ;;  %v901_v31 = vmul.f32 2.0, %v3901_v8  ;;  %3910 = vrcp.f32 %v862_v23 }
 0x264   : > { %v1012_v34 = vshrl.u32 %v995_v17, 16  ;;  %v1015_v35 = vshll.u32 %v995_v17, 16  ;;  %1108 = vst [vmem:[#allocation2 + $0x20] sm:$0xff] %v995_v17  ;;  %v918_v22 = vsub.f32 1.0, %v898_v19  ;;  %v899_v37 = vmul.f32 2.0, %v3903_v25  ;;  %v3905_v49 = vpop.eup %3904 }
 0x265   : > { %v1005_v28 = vshrl.u32 %v994_v27, 16  ;;  %v1008_v39 = vshll.u32 %v994_v27, 16  ;;  %1107 = vst [vmem:[#allocation2 + $0x8] sm:$0xff] %v994_v27  ;;  %v960_v40 = vsel %vm940_vm8, 1.0, %v920_v29  ;;  %v921_v45 = vsub.f32 1.0, %v901_v31  ;;  %v3907_v61 = vpop.eup %3906 }
 0x266   : > { %v1014_v46 = vrot.slane %v1012_v34, 7  ;;  %v1119_v47 = vrot.slane %v1015_v35, 1  ;;  %v980_v48 = vmul.f32 %v960_v40, %v5029_v36  ;;  %v958_v58 = vsel %vm938_vm9, 1.0, %v918_v22 }
 0x267   : > { %v1007_v54 = vrot.slane %v1005_v28, 7  ;;  %v1117_v55 = vrot.slane %v1008_v39, 1  ;;  %v961_v59 = vsel %vm941_vm10, 1.0, %v921_v45  ;;  %v919_v1 = vsub.f32 1.0, %v899_v37 }
 0x268   : > { %v1017_v63 = vor.u32 %v1015_v35, %v1014_v46  ;;  %v1120_v0 = vor.u32 %v1119_v47, %v1012_v34  ;;  %v981_v36 = vmul.f32 %v961_v59, %v5036_v41  ;;  %v865_v5 = vadd.f32 2.0, %v845_v24 }
 0x269   : > { %v1010_v2 = vor.u32 %v1008_v39, %v1007_v54  ;;  %v1118_v3 = vor.u32 %v1117_v55, %v1005_v28  ;;  %v848_v6 = vmul.f32 %v3895_v52, %v828_v20  ;;  %v3909_v8 = vpop.eup %3908  ;;  %v959_v25 = vsel %vm939_vm11, 1.0, %v919_v1 }
 0x26a   : > { %v1088_v17 = vsel %vm5109_vm12, 0, %v1017_v63  ;;  %v1151_v19 = vsel %vm5116_vm13, %v1120_v0, 0  ;;  %v997_v23 = vpack.c.bf16 %v981_v36, %v980_v48  ;;  %v978_v52 = vmul.f32 %v958_v58, %v5032_v38 }
 0x26b   : > { %1098 = vst [vmem:[#allocation2 + $0x18] sm:$0xff] %v1088_v17  ;;  %1161 = vst [vmem:[#allocation2 + $0x28] sm:$0xff] %v1151_v19  ;;  %v1087_v41 = vsel %vm5109_vm12, 0, %v1010_v2  ;;  %v1150_v24 = vsel %vm5116_vm13, %v1118_v3, 0  ;;  %v979_v20 = vmul.f32 %v959_v25, %v5040_v44  ;;  %3912 = vrcp.f32 %v865_v5 }
 0x26c   : > { %1097 = vst [vmem:[#allocation2] sm:$0xff] %v1087_v41  ;;  %1160 = vst [vmem:[#allocation2 + $0x10] sm:$0xff] %v1150_v24  ;;  %v1026_v27 = vshrl.u32 %v997_v23, 16  ;;  %v1029_v29 = vshll.u32 %v997_v23, 16  ;;  %v863_v31 = vadd.f32 2.0, %v843_v33  ;;  %v868_v35 = vadd.f32 2.0, %v848_v6 }
 0x26d   : > { %1110 = vst [vmem:[#allocation2 + $0x50] sm:$0xff] %v997_v23  ;;  %v996_v34 = vpack.c.bf16 %v979_v20, %v978_v52  ;;  %v826_v22 = vadd.f32 2.0, %v3905_v49  ;;  %v800_v39 = vmul.f32 1.442695, %v767_v51  ;;  %v772_v40 = vmin.f32 %v5087_v42, 20.0  ;;  %v3911_v46 = vpop.eup %3910 }
 0x26e   : > { %v1028_v37 = vrot.slane %v1026_v27, 7  ;;  %v1123_v28 = vrot.slane %v1029_v29, 1  ;;  %v904_v44 = vmul.f32 2.0, %v3909_v8  ;;  %3914 = vrcp.f32 %v863_v31 }
 0x26f   : > { %v1019_v38 = vshrl.u32 %v996_v34, 16  ;;  %v1022_v45 = vshll.u32 %v996_v34, 16  ;;  %1109 = vst [vmem:[#allocation2 + $0x38] sm:$0xff] %v996_v34  ;;  %3916 = vrcp.f32 %v868_v35  ;;  %v846_v33 = vmul.f32 %v3905_v49, %v826_v22 }
 0x270   : > { %v1031_v47 = vor.u32 %v1029_v29, %v1028_v37  ;;  %v1124_v48 = vor.u32 %v1123_v28, %v1026_v27  ;;  %v829_v58 = vadd.f32 2.0, %v3907_v61  ;;  %3918 = vpow2.f32 %v800_v39 }
 0x271   : > { %v1021_v54 = vrot.slane %v1019_v38, 7  ;;  %v1121_v55 = vrot.slane %v1022_v45, 1  ;;  %v924_v36 = vsub.f32 1.0, %v904_v44  ;;  %v902_v1 = vmul.f32 2.0, %v3911_v46 }
 0x272   : > { %v1090_v59 = vsel %vm5109_vm12, 0, %v1031_v47  ;;  %v1153_v51 = vsel %vm5116_vm13, %v1124_v48, 0  ;;  %v866_v2 = vadd.f32 2.0, %v846_v33  ;;  %v849_v3 = vmul.f32 %v3907_v61, %v829_v58 }
 0x273   : > { %1100 = vst [vmem:[#allocation2 + $0x48] sm:$0xff] %v1090_v59  ;;  %1163 = vst [vmem:[#allocation2 + $0x58] sm:$0xff] %v1153_v51  ;;  %v1024_v63 = vor.u32 %v1022_v45, %v1021_v54  ;;  %v1122_v0 = vor.u32 %v1121_v55, %v1019_v38  ;;  %v810_v5 = vmul.f32 1.442695, %v772_v40  ;;  %v5146_v49 = vadd.f32 %v5010_v18, %v5072_v4 }
 0x274   : > { %v5154_v17 = vadd.f32 %v5075_v7, %v5010_v18  ;;  %v5158_v19 = vadd.f32 %v5010_v18, %v5078_v21  ;;  %v869_v23 = vadd.f32 2.0, %v849_v3  ;;  %v964_v7 = vsel %vm944_vm14, 1.0, %v924_v36 }
 0x275   : > { %v1089_v6 = vsel %vm5109_vm12, 0, %v1024_v63  ;;  %v1152_v8 = vsel %vm5116_vm13, %v1122_v0, 0  ;;  %v3913_v61 = vpop.eup %3912  ;;  %3920 = vpow2.f32 %v810_v5  ;;  %v770_v4 = vmin.f32 %v5146_v49, 20.0 }
 0x276   : > { %1099 = vst [vmem:[#allocation2 + $0x30] sm:$0xff] %v1089_v6  ;;  %1162 = vst [vmem:[#allocation2 + $0x40] sm:$0xff] %v1152_v8  ;;  %v905_v25 = vmul.f32 2.0, %v3913_v61  ;;  %v773_v41 = vmin.f32 %v5154_v17, 20.0  ;;  %v771_v24 = vmin.f32 %v5158_v19, 20.0  ;;  %v922_v52 = vsub.f32 1.0, %v902_v1 }
 0x277   : > { %3922 = vrcp.f32 %v869_v23  ;;  %v806_v20 = vmul.f32 1.442695, %v770_v4  ;;  %v984_v35 = vmul.f32 %v964_v7, %v5045_v53  ;;  %vm948_vm2 = vcmp.gt.f32.partialorder %v5060_v32, 20.0 }
 0x278   : > { %v3915_v18 = vpop.eup %3914  ;;  %v925_v21 = vsub.f32 1.0, %v905_v25  ;;  %3924 = vrcp.f32 %v866_v2  ;;  %v812_v27 = vmul.f32 1.442695, %v773_v41  ;;  %v808_v29 = vmul.f32 1.442695, %v771_v24 }
 0x279   : > { %v3917_v31 = vpop.eup %3916  ;;  %v903_v34 = vmul.f32 2.0, %v3915_v18  ;;  %3926 = vpow2.f32 %v806_v20  ;;  %v962_v39 = vsel %vm942_vm15, 1.0, %v922_v52  ;;  %vm947_vm5 = vcmp.gt.f32.partialorder %v5081_v30, 20.0 }
 0x27a   : > { %v965_v22 = vsel %vm945_vm0, 1.0, %v925_v21  ;;  %v908_v37 = vmul.f32 2.0, %v3917_v31  ;;  %3928 = vpow2.f32 %v812_v27  ;;  %v3919_v28 = vpop.eup %3918  ;;  %v982_v48 = vmul.f32 %v962_v39, %v5048_v57 }
 0x27b   : > { %v985_v40 = vmul.f32 %v965_v22, %v5052_v62  ;;  %v923_v38 = vsub.f32 1.0, %v903_v34  ;;  %3930 = vpow2.f32 %v808_v29  ;;  %v827_v44 = vadd.f32 2.0, %v3919_v28 }
 0x27c   : > { %v928_v45 = vsub.f32 1.0, %v908_v37  ;;  %vm950_vm7 = vcmp.gt.f32.partialorder %v5146_v49, 20.0  ;;  %vm953_vm8 = vcmp.gt.f32.partialorder %v5154_v17, 20.0  ;;  %vm951_vm9 = vcmp.gt.f32.partialorder %v5158_v19, 20.0 }
 0x27d   : > { %v999_v46 = vpack.c.bf16 %v985_v40, %v984_v35  ;;  %v963_v47 = vsel %vm943_vm1, 1.0, %v923_v38  ;;  %v847_v53 = vmul.f32 %v3919_v28, %v827_v44 }
 0x27e   : > { %v983_v33 = vmul.f32 %v963_v47, %v5057_v26  ;;  %v968_v62 = vsel %vm948_vm2, 1.0, %v928_v45 }
 0x27f   : > { %v3921_v54 = vpop.eup %3920  ;;  %v1040_v55 = vshrl.u32 %v999_v46, 16  ;;  %v1043_v58 = vshll.u32 %v999_v46, 16  ;;  %1112 = vst [vmem:[#allocation2 + $0x80] sm:$0xff] %v999_v46  ;;  %v867_v51 = vadd.f32 2.0, %v847_v53  ;;  %v988_v26 = vmul.f32 %v968_v62, %v5060_v32 }
 0x280   : > { %v998_v59 = vpack.c.bf16 %v983_v33, %v982_v48  ;;  %v832_v63 = vadd.f32 2.0, %v3921_v54 }
 0x281   : > { %v3923_v0 = vpop.eup %3922  ;;  %v1042_v36 = vrot.slane %v1040_v55, 7  ;;  %v1127_v1 = vrot.slane %v1043_v58, 1  ;;  %3932 = vrcp.f32 %v867_v51 }
 0x282   : > { %v3925_v2 = vpop.eup %3924  ;;  %v1033_v57 = vshrl.u32 %v998_v59, 16  ;;  %v1036_v3 = vshll.u32 %v998_v59, 16  ;;  %1111 = vst [vmem:[#allocation2 + $0x68] sm:$0xff] %v998_v59  ;;  %v909_v5 = vmul.f32 2.0, %v3923_v0  ;;  %v852_v23 = vmul.f32 %v3921_v54, %v832_v63 }
 0x283   : > { %v3927_v6 = vpop.eup %3926  ;;  %v1045_v8 = vor.u32 %v1043_v58, %v1042_v36  ;;  %v1128_v61 = vor.u32 %v1127_v1, %v1040_v55  ;;  %v906_v40 = vmul.f32 2.0, %v3925_v2 }
 0x284   : > { %v3929_v4 = vpop.eup %3928  ;;  %v1035_v25 = vrot.slane %v1033_v57, 7  ;;  %v1125_v41 = vrot.slane %v1036_v3, 1  ;;  %v929_v24 = vsub.f32 1.0, %v909_v5  ;;  %v830_v7 = vadd.f32 2.0, %v3927_v6 }
 0x285   : > { %v3931_v52 = vpop.eup %3930  ;;  %v1092_v20 = vsel %vm5109_vm12, 0, %v1045_v8  ;;  %v1155_v18 = vsel %vm5116_vm13, %v1128_v61, 0  ;;  %v872_v21 = vadd.f32 2.0, %v852_v23  ;;  %v833_v32 = vadd.f32 2.0, %v3929_v4 }
 0x286   : > { %1102 = vst [vmem:[#allocation2 + $0x78] sm:$0xff] %v1092_v20  ;;  %1165 = vst [vmem:[#allocation2 + $0x88] sm:$0xff] %v1155_v18  ;;  %v1038_v27 = vor.u32 %v1036_v3, %v1035_v25  ;;  %v1126_v29 = vor.u32 %v1125_v41, %v1033_v57  ;;  %v969_v31 = vsel %vm949_vm3, 1.0, %v929_v24  ;;  %v850_v34 = vmul.f32 %v3927_v6, %v830_v7 }
 0x287   : > { %v989_v35 = vmul.f32 %v969_v31, %v5068_v60  ;;  %3934 = vrcp.f32 %v872_v21  ;;  %v853_v22 = vmul.f32 %v3929_v4, %v833_v32  ;;  %v831_v37 = vadd.f32 2.0, %v3931_v52 }
 0x288   : > { %v1091_v28 = vsel %vm5109_vm12, 0, %v1038_v27  ;;  %v1154_v39 = vsel %vm5116_vm13, %v1126_v29, 0  ;;  %v870_v38 = vadd.f32 2.0, %v850_v34  ;;  %v926_v33 = vsub.f32 1.0, %v906_v40 }
 0x289   : > { %1101 = vst [vmem:[#allocation2 + $0x60] sm:$0xff] %v1091_v28  ;;  %1164 = vst [vmem:[#allocation2 + $0x70] sm:$0xff] %v1154_v39  ;;  %v1001_v45 = vpack.c.bf16 %v989_v35, %v988_v26  ;;  %v873_v44 = vadd.f32 2.0, %v853_v22  ;;  %v851_v46 = vmul.f32 %v3931_v52, %v831_v37 }
 0x28a   : > { %3936 = vrcp.f32 %v870_v38  ;;  %v966_v51 = vsel %vm946_vm4, 1.0, %v926_v33 }
 0x28b   : > { %v1054_v47 = vshrl.u32 %v1001_v45, 16  ;;  %v1057_v48 = vshll.u32 %v1001_v45, 16  ;;  %1114 = vst [vmem:[#allocation2 + $0xb0] sm:$0xff] %v1001_v45  ;;  %3938 = vrcp.f32 %v873_v44  ;;  %v871_v60 = vadd.f32 2.0, %v851_v46  ;;  %v3933_v53 = vpop.eup %3932 }
 0x28c   : > { %v907_v58 = vmul.f32 2.0, %v3933_v53  ;;  %v986_v3 = vmul.f32 %v966_v51, %v5065_v56  ;;  %v4453_v51 = vmov (!%p3014_p12), 0  }
 0x28d   : > { %v1056_v54 = vrot.slane %v1054_v47, 7  ;;  %v1131_v55 = vrot.slane %v1057_v48, 1  ;;  %3940 = vrcp.f32 %v871_v60  ;;  %1174 = vst [vmem:[#allocation2] sm:$0xff] (!%p3014_p12), %v4453_v51  ;;  %1175 = vst [vmem:[#allocation2 + $0x8] sm:$0xff] (!%p3014_p12), %v4453_v51 }
 0x28e   : > { %v927_v63 = vsub.f32 1.0, %v907_v58  ;;  %1176 = vst [vmem:[#allocation2 + $0x10] sm:$0xff] (!%p3014_p12), %v4453_v51 }
 0x28f   : > { %v1059_v62 = vor.u32 %v1057_v48, %v1056_v54  ;;  %v1132_v59 = vor.u32 %v1131_v55, %v1054_v47 }
 0x290   : > { %v967_v2 = vsel %vm947_vm5, 1.0, %v927_v63 }
 0x291   : > { %v3935_v0 = vpop.eup %3934  ;;  %v1094_v36 = vsel %vm5109_vm12, 0, %v1059_v62  ;;  %v1157_v1 = vsel %vm5116_vm13, %v1132_v59, 0  ;;  %v987_v26 = vmul.f32 %v967_v2, %v5081_v30 }
 0x292   : > { %1104 = vst [vmem:[#allocation2 + $0xa8] sm:$0xff] %v1094_v36  ;;  %1167 = vst [vmem:[#allocation2 + $0xb8] sm:$0xff] %v1157_v1  ;;  %v912_v57 = vmul.f32 2.0, %v3935_v0 }
 0x293   : > { %v1000_v61 = vpack.c.bf16 %v987_v26, %v986_v3 }
 0x294   : > { %v3937_v5 = vpop.eup %3936  ;;  %v932_v6 = vsub.f32 1.0, %v912_v57 }
 0x295   : > { %v3939_v8 = vpop.eup %3938  ;;  %v910_v23 = vmul.f32 2.0, %v3937_v5  ;;  %v1047_v41 = vshrl.u32 %v1000_v61, 16  ;;  %v1050_v24 = vshll.u32 %v1000_v61, 16  ;;  %1113 = vst [vmem:[#allocation2 + $0x98] sm:$0xff] %v1000_v61 }
 0x296   : > { %v913_v4 = vmul.f32 2.0, %v3939_v8  ;;  %v972_v52 = vsel %vm952_vm6, 1.0, %v932_v6 }
 0x297   : > { %v3941_v25 = vpop.eup %3940  ;;  %v930_v7 = vsub.f32 1.0, %v910_v23  ;;  %v1049_v18 = vrot.slane %v1047_v41, 7  ;;  %v1129_v30 = vrot.slane %v1050_v24, 1  ;;  %v992_v34 = vmul.f32 %v972_v52, %v5087_v42 }
 0x298   : > { %v933_v20 = vsub.f32 1.0, %v913_v4  ;;  %v911_v56 = vmul.f32 2.0, %v3941_v25 }
 0x299   : > { %v970_v21 = vsel %vm950_vm7, 1.0, %v930_v7  ;;  %v1052_v29 = vor.u32 %v1050_v24, %v1049_v18  ;;  %v1130_v31 = vor.u32 %v1129_v30, %v1047_v41 }
 0x29a   : > { %v973_v32 = vsel %vm953_vm8, 1.0, %v933_v20  ;;  %v931_v27 = vsub.f32 1.0, %v911_v56  ;;  %v990_v22 = vmul.f32 %v970_v21, %v5146_v49 }
 0x29b   : > { %v993_v35 = vmul.f32 %v973_v32, %v5154_v17  ;;  %v1093_v28 = vsel %vm5109_vm12, 0, %v1052_v29  ;;  %v1156_v39 = vsel %vm5116_vm13, %v1130_v31, 0 }
 0x29c   : > { %v971_v37 = vsel %vm951_vm9, 1.0, %v931_v27  ;;  %1103 = vst [vmem:[#allocation2 + $0x90] sm:$0xff] %v1093_v28  ;;  %1166 = vst [vmem:[#allocation2 + $0xa0] sm:$0xff] %v1156_v39 }
 0x29d   : > { %v1003_v40 = vpack.c.bf16 %v993_v35, %v992_v34  ;;  %v991_v38 = vmul.f32 %v971_v37, %v5158_v19 }
 0x29f   : > { %v1068_v45 = vshrl.u32 %v1003_v40, 16  ;;  %v1071_v44 = vshll.u32 %v1003_v40, 16  ;;  %1116 = vst [vmem:[#allocation2 + $0xe0] sm:$0xff] %v1003_v40  ;;  %v1002_v42 = vpack.c.bf16 %v991_v38, %v990_v22 }
 0x2a1   : > { %v1070_v46 = vrot.slane %v1068_v45, 7  ;;  %v1135_v17 = vrot.slane %v1071_v44, 1  ;;  %v1061_v47 = vshrl.u32 %v1002_v42, 16  ;;  %v1064_v49 = vshll.u32 %v1002_v42, 16  ;;  %1115 = vst [vmem:[#allocation2 + $0xc8] sm:$0xff] %v1002_v42 }
 0x2a2   : > { %1173 = sbr.rel (%p3014_p12) target bundleno = 681 (0x2a9), region = 80 }
 0x2a3   : > { %v1073_v48 = vor.u32 %v1071_v44, %v1070_v46  ;;  %v1136_v60 = vor.u32 %v1135_v17, %v1068_v45  ;;  %v1063_v33 = vrot.slane %v1061_v47, 7  ;;  %v1133_v53 = vrot.slane %v1064_v49, 1 }
 0x2a5   : > { %v1096_v54 = vsel %vm5109_vm12, 0, %v1073_v48  ;;  %v1159_v19 = vsel %vm5116_vm13, %v1136_v60, 0  ;;  %v1066_v55 = vor.u32 %v1064_v49, %v1063_v33  ;;  %v1134_v58 = vor.u32 %v1133_v53, %v1061_v47 }
 0x2a6   : > { %1106 = vst [vmem:[#allocation2 + $0xd8] sm:$0xff] %v1096_v54  ;;  %1169 = vst [vmem:[#allocation2 + $0xe8] sm:$0xff] %v1159_v19 }
 0x2a7   : > { %v1095_v62 = vsel %vm5109_vm12, 0, %v1066_v55  ;;  %v1158_v59 = vsel %vm5116_vm13, %v1134_v58, 0 }
 0x2a8   : > { %1105 = vst [vmem:[#allocation2 + $0xc0] sm:$0xff] %v1095_v62  ;;  %1168 = vst [vmem:[#allocation2 + $0xd0] sm:$0xff] %v1158_v59 }
 0x2a9 PF: > { %s5781_s22 = sld [smem:[#allocation26_spill]] }
 0x2af   : > { %p3015_p6 = scmp.ne.s32.totalorder %s5781_s22, 1 }
 0x2b0   : > { %v4454_v43 = vmov (!%p3015_p6), 0  }
 0x2b1   : > { %1180 = sbr.rel (%p3015_p6) target bundleno = 696 (0x2b8), region = 84  ;;  %1182 = vst [vmem:[#allocation2 + $0xd8] sm:$0xff] (!%p3015_p6), %v4454_v43  ;;  %1183 = vst [vmem:[#allocation2 + $0xe0] sm:$0xff] (!%p3015_p6), %v4454_v43 }
 0x2b2   : > { %1184 = vst [vmem:[#allocation2 + $0xe8] sm:$0xff] (!%p3015_p6), %v4454_v43 }
 0x2b8 PF: > { %v3942_v50 = vld [vmem:[#allocation12 + $0x100] sm:$0xff]   ;;  %v3945_v36 = vld [vmem:[#allocation12 + $0x108] sm:$0xff]   ;;  %v3948_v57 = vld [vmem:[#allocation12 + $0x110] sm:$0xff]   ;;  %s5782_s16 = sld [smem:[#allocation26_spill]]  ;;  %s5783_s21 = sld [smem:[#allocation27_spill]] }
 0x2b9   : > { %v3943_v63 = vld [vmem:[#allocation12 + $0x140] sm:$0xff]   ;;  %3201 = vmatprep.subr.bf16.mxu1 %v3942_v50  ;;  %v3946_v1 = vld [vmem:[#allocation12 + $0x148] sm:$0xff]   ;;  %v3949_v3 = vld [vmem:[#allocation12 + $0x150] sm:$0xff]   ;;  %s2779_s12 = sshll.u32 %s5215_s15, 4  ;;  %s5784_s26 = sld [smem:[#allocation43_spill]]  ;;  %s5582_s12 = int_to_ptr.vmem [resolvable:$true] %s2779_s12 }
 0x2ba   : > { %v3944_v0 = vld [vmem:[#allocation12 + $0xc0] sm:$0xff]   ;;  %3477 = vmatprep.subr.bf16.mxu0 %v3943_v63  ;;  %v3947_v2 = vld [vmem:[#allocation12 + $0xc8] sm:$0xff]   ;;  %v3950_v26 = vld [vmem:[#allocation12 + $0xd0] sm:$0xff]   ;;  %s2763_s18 = scalar_lea.sflag [#allocation5], %s4942_s7  ;;  %s4280_s5 = scalar_lea.vmem %s5582_s12, 1024 }
 0x2bb   : > { %3202 = vmatpush3.bf16.msra.mxu1 %v3944_v0  ;;  %3478 = vmatpush3.bf16.msra.mxu0 %v3943_v63  ;;  %v3951_v5 = vld [vmem:[#allocation12 + $0x118] sm:$0xff]   ;;  %v3954_v61 = vld [vmem:[#allocation12 + $0x120] sm:$0xff]   ;;  %v3957_v25 = vld [vmem:[#allocation12 + $0x128] sm:$0xff]   ;;  %p4281_p4 = scmp.ne.s32.totalorder %s5582_s12, %s4280_s5  ;;  %p5786_p0 = scmp.ne.s32.totalorder %s5746_s2, 0 }
 0x2bc   : > { %3203 = vmatprep.subr.bf16.mxu1 %v3945_v36  ;;  %3479 = vmatprep.subr.bf16.mxu0 %v3946_v1  ;;  %v3952_v6 = vld [vmem:[#allocation12 + $0x158] sm:$0xff]   ;;  %v3955_v23 = vld [vmem:[#allocation12 + $0x160] sm:$0xff]   ;;  %v3958_v41 = vld [vmem:[#allocation12 + $0x168] sm:$0xff]   ;;  %s4455_s25 = smov [#allocation15]  }
 0x2bd   : > { %v3953_v8 = vld [vmem:[#allocation12 + $0xd8] sm:$0xff]   ;;  %v3956_v4 = vld [vmem:[#allocation12 + $0xe0] sm:$0xff]   ;;  %v3959_v24 = vld [vmem:[#allocation12 + $0xe8] sm:$0xff]   ;;  %p4282_p7 = pnand %p4281_p4, %p5786_p0  ;;  %s4284_s3 = sshll.u32 %s4455_s25, 4  ;;  %s4285_s3 = int_to_ptr.vmem [resolvable:$false] %s4284_s3 }
 0x2be   : > { %v3960_v7 = vld [vmem:[#allocation12 + $0x130] sm:$0xff]   ;;  %v3963_v56 = vld [vmem:[#allocation12 + $0x138] sm:$0xff]   ;;  %v3966_v27 = vld [vmem:[#allocation12 + $0x80] sm:$0xff]   ;;  %s3135_s19 = sshll.u32 %s5782_s16, 4  ;;  %s3108_s6 = sshll.u32 %s5783_s21, 5 }
 0x2bf   : > { %3204 = vmatpush3.bf16.msra.mxu1 %v3947_v2  ;;  %3480 = vmatpush3.bf16.msra.mxu0 %v3946_v1  ;;  %v3961_v52 = vld [vmem:[#allocation12 + $0x170] sm:$0xff]   ;;  %v3964_v21 = vld [vmem:[#allocation12 + $0x178] sm:$0xff]   ;;  %v5225_v29 = vld [vmem:[#allocation2 + $0x18] sm:$0xff]  ;;  %s2776_s23 = sadd.s32 %s3135_s19, %s3108_s6  ;;  %s5785_s20 = smov %s5784_s26 }
 0x2c0   : > { %3205 = vmatprep.subr.bf16.mxu1 %v3948_v57  ;;  %3481 = vmatprep.subr.bf16.mxu0 %v3949_v3  ;;  %v3962_v20 = vld [vmem:[#allocation12 + $0xf0] sm:$0xff]   ;;  %v3965_v32 = vld [vmem:[#allocation12 + $0xf8] sm:$0xff]   ;;  %v3967_v34 = vld [vmem:[#allocation12 + $0x88] sm:$0xff]   ;;  %s3109_s13 = sshll.u32 %s2776_s23, 6  ;;  %p4283_p3 = pneg %p4282_p7 }
 0x2c1   : > { %v5219_v18 = vld [vmem:[#allocation2 + $0x20] sm:$0xff]  ;;  %v5221_v30 = vld [vmem:[#allocation2 + $0x28] sm:$0xff]  ;;  %v5229_v35 = vld [vmem:[#allocation2 + $0x38] sm:$0xff]  ;;  %s5587_s28 = scalar_lea.hbm %s5784_s26, %s3109_s13  ;;  %s4286_s4 = scalar_lea.vmem %s4285_s3, 2048 }
 0x2c2   : > { %1507 = vmatprep.mubr.bf16.mxu1 %v5219_v18  ;;  %3493 = vmatprep.mubr.bf16.mxu0 %v5221_v30  ;;  %v5227_v31 = vld [vmem:[#allocation2 + $0x40] sm:$0xff]  ;;  %v5231_v22 = vld [vmem:[#allocation2 + $0x58] sm:$0xff]  ;;  %v5237_v40 = vld [vmem:[#allocation2 + $0x30] sm:$0xff]  ;;  %p4287_p9 = scmp.lt.s32.totalorder %s5582_s12, %s4285_s3  ;;  %p4288_p8 = scmp.lt.s32.totalorder %s4286_s4, %s4280_s5 }
 0x2c3   : > { %3206 = vmatpush3.bf16.msra.mxu1 %v3950_v26  ;;  %3482 = vmatpush3.bf16.msra.mxu0 %v3949_v3  ;;  %v3968_v37 = vld [vmem:[#allocation12 + $0x90] sm:$0xff]   ;;  %v3973_v28 = vld [vmem:[#allocation12 + $0x40] sm:$0xff]   ;;  %v3969_v45 = vld [vmem:[#allocation12 + $0x98] sm:$0xff]  }
 0x2c4   : > { %3207 = vmatprep.subr.bf16.mxu1 %v3951_v5  ;;  %3483 = vmatprep.subr.bf16.mxu0 %v3952_v6  ;;  %v3974_v39 = vld [vmem:[#allocation12] sm:$0xff]   ;;  %v5243_v42 = vld [vmem:[#allocation2 + $0x88] sm:$0xff]  ;;  %v3978_v46 = vld [vmem:[#allocation12 + $0x48] sm:$0xff]   ;;  %p4289_p5 = por %p4288_p8, %p4287_p9 }
 0x2c5   : > { %v5239_v38 = vld [vmem:[#allocation2 + $0x70] sm:$0xff]  ;;  %v3979_v17 = vld [vmem:[#allocation12 + $0x8] sm:$0xff]   ;;  %v5249_v49 = vld [vmem:[#allocation2 + $0x48] sm:$0xff] }
 0x2c6   : > { %v5241_v44 = vld [vmem:[#allocation2 + $0x50] sm:$0xff]  ;;  %v5251_v48 = vld [vmem:[#allocation2 + $0xa0] sm:$0xff]  ;;  %v5253_v53 = vld [vmem:[#allocation2 + $0x68] sm:$0xff]  ;;  %p4290_p1 = pnand %p4289_p5, %p4283_p3 }
 0x2c7   : > { %3208 = vmatpush3.bf16.msra.mxu1 %v3953_v8  ;;  %3484 = vmatpush3.bf16.msra.mxu0 %v3952_v6  ;;  %v3970_v47 = vld [vmem:[#allocation12 + $0xa0] sm:$0xff]   ;;  %v3971_v60 = vld [vmem:[#allocation12 + $0xa8] sm:$0xff]   ;;  %v3982_v33 = vld [vmem:[#allocation12 + $0x50] sm:$0xff]  }
 0x2c8   : > { %3209 = vmatprep.subr.bf16.mxu1 %v3954_v61  ;;  %3485 = vmatprep.subr.bf16.mxu0 %v3955_v23  ;;  %v5255_v54 = vld [vmem:[#allocation2 + $0xb8] sm:$0xff]  ;;  %v3984_v19 = vld [vmem:[#allocation12 + $0x10] sm:$0xff]   ;;  %v3986_v55 = vld [vmem:[#allocation12 + $0x58] sm:$0xff]  }
 0x2c9   : > { %v3972_v58 = vld [vmem:[#allocation12 + $0xb0] sm:$0xff]   ;;  %v3988_v59 = vld [vmem:[#allocation12 + $0x18] sm:$0xff]   ;;  %v3990_v0 = vld [vmem:[#allocation12 + $0x60] sm:$0xff]  }
 0x2ca   : > { %v5261_v62 = vld [vmem:[#allocation2 + $0x60] sm:$0xff]  ;;  %v5263_v51 = vld [vmem:[#allocation2 + $0xd0] sm:$0xff]  ;;  %v5270_v57 = vld [vmem:[#allocation2 + $0x78] sm:$0xff] }
 0x2cb   : > { %3210 = vmatpush3.bf16.msra.mxu1 %v3956_v4  ;;  %3486 = vmatpush3.bf16.msra.mxu0 %v3955_v23  ;;  %v3975_v43 = vld [vmem:[#allocation12 + $0xb8] sm:$0xff]   ;;  %v5265_v50 = vld [vmem:[#allocation2 + $0x80] sm:$0xff]  ;;  %v3992_v36 = vld [vmem:[#allocation12 + $0x20] sm:$0xff]  }
 0x2cc   : > { %3211 = vmatprep.subr.bf16.mxu1 %v3957_v25  ;;  %3487 = vmatprep.subr.bf16.mxu0 %v3958_v41  ;;  %v1187_v63 = vld [vmem:[#allocation2 + $0x10] sm:$0xff]  ;;  %v3994_v1 = vld [vmem:[#allocation12 + $0x68] sm:$0xff]   ;;  %v3998_v8 = vld [vmem:[#allocation12 + $0x70] sm:$0xff]  }
 0x2cd   : > { %v3976_v2 = vld [vmem:[#allocation12 + $0x1c0] sm:$0xff]   ;;  %v3980_v26 = vld [vmem:[#allocation12 + $0x1c8] sm:$0xff]   ;;  %v3983_v23 = vld [vmem:[#allocation12 + $0x1d0] sm:$0xff]  }
 0x2ce   : > { %v3977_v3 = vld [vmem:[#allocation12 + $0x180] sm:$0xff]   ;;  %v3996_v6 = vld [vmem:[#allocation12 + $0x28] sm:$0xff]   ;;  %v4000_v4 = vld [vmem:[#allocation12 + $0x30] sm:$0xff]  }
 0x2cf   : > { %3212 = vmatpush3.bf16.msra.mxu1 %v3959_v24  ;;  %3488 = vmatpush3.bf16.msra.mxu0 %v3958_v41  ;;  %v5272_v5 = vld [vmem:[#allocation2 + $0x98] sm:$0xff]  ;;  %v5278_v25 = vld [vmem:[#allocation2 + $0x90] sm:$0xff]  ;;  %v3985_v41 = vld [vmem:[#allocation12 + $0x190] sm:$0xff]  }
 0x2d0   : > { %3213 = vmatprep.subr.bf16.mxu1 %v3960_v7  ;;  %3489 = vmatprep.subr.bf16.mxu0 %v3961_v52  ;;  %v3981_v61 = vld [vmem:[#allocation12 + $0x188] sm:$0xff]   ;;  %v3987_v24 = vld [vmem:[#allocation12 + $0x1d8] sm:$0xff]  }
 0x2d1   : > { %v5280_v7 = vld [vmem:[#allocation2 + $0xb0] sm:$0xff] }
 0x2d3   : > { %3214 = vmatpush3.bf16.msra.mxu1 %v3962_v20  ;;  %3490 = vmatpush3.bf16.msra.mxu0 %v3961_v52  ;;  %v4002_v52 = vld [vmem:[#allocation12 + $0x78] sm:$0xff]  }
 0x2d4   : > { %3215 = vmatprep.subr.bf16.mxu1 %v3963_v56  ;;  %3491 = vmatprep.subr.bf16.mxu0 %v3964_v21  ;;  %v4004_v20 = vld [vmem:[#allocation12 + $0x38] sm:$0xff]  }
 0x2d5   : > { %v3989_v56 = vld [vmem:[#allocation12 + $0x198] sm:$0xff]  }
 0x2d7   : > { %3216 = vmatpush3.bf16.msra.mxu1 %v3965_v32  ;;  %3492 = vmatpush3.bf16.msra.mxu0 %v3964_v21  ;;  %v5286_v21 = vld [vmem:[#allocation2 + $0xa8] sm:$0xff]  ;;  %v3993_v32 = vld [vmem:[#allocation12 + $0x1a0] sm:$0xff]  }
 0x2d8   : > { %3509 = vmatprep.subr.bf16.mxu0 %v3966_v27  ;;  %3281 = vmatprep.subr.bf16.mxu1 %v3973_v28  ;;  %v3999_v28 = vld [vmem:[#allocation12 + $0x1f0] sm:$0xff]  }
 0x2da   : > { %1508 = vmatmul.mubr.bf16.vlgmr.msra.gmra.mrb[20].mxu1 %v5225_v29  ;;  %3494 = vmatmul.mubr.bf16.vlgmr.msra.gmra.mrb[0].mxu0 %v5227_v31 }
 0x2db   : > { %3510 = vmatpush3.bf16.msra.mxu0 %v3966_v27  ;;  %1515 = vmatprep.mubr.bf16.mxu1 %v5229_v35  ;;  %v3995_v27 = vld [vmem:[#allocation12 + $0x1e8] sm:$0xff]  }
 0x2dc   : > { %3511 = vmatprep.subr.bf16.mxu0 %v3967_v34  ;;  %3497 = vmatprep.mubr.bf16.mxu0 %v5231_v22 }
 0x2dd   : > { %3282 = vmatpush3.bf16.msra.mxu1 %v3974_v39  ;;  %v5294_v39 = vld [vmem:[#allocation2 + $0xc0] sm:$0xff] }
 0x2de   : > { %3283 = vmatprep.subr.bf16.mxu1 %v3978_v46  ;;  %v4003_v46 = vld [vmem:[#allocation12 + $0x1f8] sm:$0xff]  }
 0x2df   : > { %3512 = vmatpush3.bf16.msra.mxu0 %v3967_v34  ;;  %v5288_v34 = vld [vmem:[#allocation2 + $0xc8] sm:$0xff] }
 0x2e0   : > { %3513 = vmatprep.subr.bf16.mxu0 %v3968_v37 }
 0x2e1   : > { %3284 = vmatpush3.bf16.msra.mxu1 %v3979_v17  ;;  %v1186_v17 = vld [vmem:[#allocation2 + $0x8] sm:$0xff] }
 0x2e2   : > { %1516 = vmatmul.mubr.bf16.gmra.mrb[24].mxu1 %v5237_v40  ;;  %3498 = vmatmul.mubr.bf16.gmra.mrb[4].mxu0 %v5239_v38 }
 0x2e3   : > { %3514 = vmatpush3.bf16.msra.mxu0 %v3968_v37  ;;  %1523 = vmatprep.mubr.bf16.mxu1 %v5241_v44  ;;  %v3997_v37 = vld [vmem:[#allocation12 + $0x1a8] sm:$0xff]  }
 0x2e4   : > { %3515 = vmatprep.subr.bf16.mxu0 %v3969_v45  ;;  %3501 = vmatprep.mubr.bf16.mxu0 %v5243_v42 }
 0x2e5   : > { %3285 = vmatprep.subr.bf16.mxu1 %v3982_v33  ;;  %v1185_v33 = vld [vmem:[#allocation2] sm:$0xff] }
 0x2e6   : > { %3286 = vmatpush3.bf16.msra.mxu1 %v3984_v19  ;;  %v4007_v19 = vld [vmem:[#allocation12 + $0x208] sm:$0xff]  }
 0x2e7   : > { %3516 = vmatpush3.bf16.msra.mxu0 %v3969_v45  ;;  %3287 = vmatprep.subr.bf16.mxu1 %v3986_v55  ;;  %v4001_v45 = vld [vmem:[#allocation12 + $0x1b0] sm:$0xff]  }
 0x2e8   : > { %3517 = vmatprep.subr.bf16.mxu0 %v3970_v47  ;;  %v4008_v55 = vld [vmem:[#allocation12 + $0x210] sm:$0xff]  }
 0x2ea   : > { %1524 = vmatmul.mubr.bf16.gmra.mrb[28].mxu1 %v5249_v49  ;;  %3502 = vmatmul.mubr.bf16.gmra.mrb[8].mxu0 %v5251_v48 }
 0x2eb   : > { %3518 = vmatpush3.bf16.msra.mxu0 %v3970_v47  ;;  %1531 = vmatprep.mubr.bf16.mxu1 %v5253_v53  ;;  %v4005_v47 = vld [vmem:[#allocation12 + $0x1b8] sm:$0xff]  }
 0x2ec   : > { %3519 = vmatprep.subr.bf16.mxu0 %v3971_v60  ;;  %3505 = vmatprep.mubr.bf16.mxu0 %v5255_v54 }
 0x2ed   : > { %3288 = vmatpush3.bf16.msra.mxu1 %v3988_v59  ;;  %v4010_v59 = vld [vmem:[#allocation12 + $0x220] sm:$0xff]  }
 0x2ee   : > { %3289 = vmatprep.subr.bf16.mxu1 %v3990_v0 }
 0x2ef   : > { %3520 = vmatpush3.bf16.msra.mxu0 %v3971_v60  ;;  %v4006_v60 = vld [vmem:[#allocation12 + $0x200] sm:$0xff]  }
 0x2f0   : > { %3521 = vmatprep.subr.bf16.mxu0 %v3972_v58 }
 0x2f1   : > { %3290 = vmatpush3.bf16.msra.mxu1 %v3992_v36 }
 0x2f2   : > { %1532 = vmatmul.mubr.bf16.gmra.mrb[32].mxu1 %v5261_v62  ;;  %3506 = vmatmul.mubr.bf16.gmra.mrb[12].mxu0 %v5263_v51 }
 0x2f3   : > { %3522 = vmatpush3.bf16.msra.mxu0 %v3972_v58  ;;  %1539 = vmatprep.mubr.bf16.mxu1 %v5265_v50  ;;  %v4009_v58 = vld [vmem:[#allocation12 + $0x218] sm:$0xff]  }
 0x2f4   : > { %3523 = vmatprep.subr.bf16.mxu0 %v3975_v43  ;;  %3525 = vmatprep.mubr.bf16.mxu0 %v1187_v63 }
 0x2f5   : > { %3291 = vmatprep.subr.bf16.mxu1 %v3994_v1 }
 0x2f6   : > { %3292 = vmatpush3.bf16.msra.mxu1 %v3996_v6 }
 0x2f7   : > { %3524 = vmatpush3.bf16.msra.mxu0 %v3975_v43  ;;  %3293 = vmatprep.subr.bf16.mxu1 %v3998_v8 }
 0x2f8   : > { %3361 = vmatprep.subr.bf16.mxu0 %v3976_v2 }
 0x2fa   : > { %1540 = vmatmul.mubr.bf16.gmra.mrb[36].mxu1 %v5270_v57  ;;  %3526 = vmatmul.mubr.bf16.vlgmr.msra.gmra.mrb[0].mxu0 %v5221_v30  ;;  %v3991_v30 = vld [vmem:[#allocation12 + $0x1e0] sm:$0xff]  }
 0x2fb   : > { %3362 = vmatpush3.bf16.msra.mxu0 %v3977_v3  ;;  %1547 = vmatprep.mubr.bf16.mxu1 %v5272_v5 }
 0x2fc   : > { %3363 = vmatprep.subr.bf16.mxu0 %v3980_v26  ;;  %3529 = vmatprep.mubr.bf16.mxu0 %v5227_v31 }
 0x2fd   : > { %3294 = vmatpush3.bf16.msra.mxu1 %v4000_v4 }
 0x2fe   : > { %3295 = vmatprep.subr.bf16.mxu1 %v4002_v52 }
 0x2ff   : > { %3364 = vmatpush3.bf16.msra.mxu0 %v3981_v61 }
 0x300   : > { %3365 = vmatprep.subr.bf16.mxu0 %v3983_v23 }
 0x301   : > { %3296 = vmatpush3.bf16.msra.mxu1 %v4004_v20 }
 0x302   : > { %1548 = vmatmul.mubr.bf16.gmra.mrb[40].mxu1 %v5278_v25  ;;  %3530 = vmatmul.mubr.bf16.gmra.mrb[4].mxu0 %v5231_v22 }
 0x303   : > { %3366 = vmatpush3.bf16.msra.mxu0 %v3985_v41  ;;  %1555 = vmatprep.mubr.bf16.mxu1 %v5280_v7 }
 0x304   : > { %3367 = vmatprep.subr.bf16.mxu0 %v3987_v24  ;;  %3533 = vmatprep.mubr.bf16.mxu0 %v5239_v38 }
 0x307   : > { %3368 = vmatpush3.bf16.msra.mxu0 %v3989_v56 }
 0x308   : > { %3369 = vmatprep.subr.bf16.mxu0 %v3991_v30 }
 0x30a   : > { %1556 = vmatmul.mubr.bf16.gmra.mrb[44].mxu1 %v5286_v21  ;;  %3534 = vmatmul.mubr.bf16.gmra.mrb[8].mxu0 %v5243_v42 }
 0x30b   : > { %3370 = vmatpush3.bf16.msra.mxu0 %v3993_v32  ;;  %1563 = vmatprep.mubr.bf16.mxu1 %v5288_v34 }
 0x30c   : > { %3371 = vmatprep.subr.bf16.mxu0 %v3995_v27  ;;  %3537 = vmatprep.mubr.bf16.mxu0 %v5251_v48 }
 0x30f   : > { %3372 = vmatpush3.bf16.msra.mxu0 %v3997_v37 }
 0x310   : > { %3373 = vmatprep.subr.bf16.mxu0 %v3999_v28 }
 0x312   : > { %1564 = vmatmul.mubr.bf16.gmra.mrb[48].mxu1 %v5294_v39  ;;  %3538 = vmatmul.mubr.bf16.gmra.mrb[12].mxu0 %v5255_v54 }
 0x313   : > { %3374 = vmatpush3.bf16.msra.mxu0 %v4001_v45  ;;  %1845 = vmatprep.mubr.bf16.mxu1 %v1186_v17 }
 0x314   : > { %3375 = vmatprep.subr.bf16.mxu0 %v4003_v46  ;;  %2257 = vmatprep.mubr.bf16.mxu0 %v5229_v35 }
 0x317   : > { %3376 = vmatpush3.bf16.msra.mxu0 %v4005_v47 }
 0x318   : > { %3541 = vmatprep.subr.bf16.mxu0 %v4006_v60 }
 0x31a   : > { %1846 = vmatmul.mubr.bf16.vlgmr.msra.gmra.mrb[52].mxu1 %v1185_v33  ;;  %2258 = vmatmul.mubr.bf16.vlgmr.msra.gmra.mrb[16].mxu0 %v5237_v40 }
 0x31b   : > { %3542 = vmatpush3.bf16.msra.mxu0 %v4006_v60  ;;  %1853 = vmatprep.mubr.bf16.mxu1 %v5219_v18  ;;  %v4011_v18 = vld [vmem:[#allocation12 + $0x228] sm:$0xff]  }
 0x31c   : > { %2265 = vmatprep.mubr.bf16.mxu0 %v5241_v44  ;;  %3543 = vmatprep.subr.bf16.mxu0 %v4007_v19 }
 0x31f   : > { %3544 = vmatpush3.bf16.msra.mxu0 %v4007_v19 }
 0x320   : > { %3545 = vmatprep.subr.bf16.mxu0 %v4008_v55 }
 0x322   : > { %1854 = vmatmul.mubr.bf16.gmra.mrb[56].mxu1 %v5225_v29  ;;  %2266 = vmatmul.mubr.bf16.gmra.mrb[20].mxu0 %v5249_v49  ;;  %v4012_v29 = vld [vmem:[#allocation12 + $0x230] sm:$0xff]  }
 0x323   : > { %1861 = vmatprep.mubr.bf16.mxu1 %v5229_v35  ;;  %2273 = vmatprep.mubr.bf16.mxu0 %v5253_v53  ;;  %v4013_v35 = vld [vmem:[#allocation12 + $0x238] sm:$0xff]  }
 0x324   : > { %3546 = vmatpush3.bf16.msra.mxu0 %v4008_v55 }
 0x325   : > { %3547 = vmatprep.subr.bf16.mxu0 %v4009_v58 }
 0x328   : > { %3548 = vmatpush3.bf16.msra.mxu0 %v4009_v58 }
 0x329   : > { %3549 = vmatprep.subr.bf16.mxu0 %v4010_v59 }
 0x32a   : > { %1862 = vmatmul.mubr.bf16.gmra.mrb[60].mxu1 %v5237_v40  ;;  %2274 = vmatmul.mubr.bf16.gmra.mrb[24].mxu0 %v5261_v62  ;;  %v2030_v40 = vld [vmem:[#allocation2 + $0xe0] sm:$0xff] }
 0x32b   : > { %1869 = vmatprep.mubr.bf16.mxu1 %v5241_v44  ;;  %2281 = vmatprep.mubr.bf16.mxu0 %v5265_v50  ;;  %v2029_v44 = vld [vmem:[#allocation2 + $0xd8] sm:$0xff] }
 0x32c   : > { %3550 = vmatpush3.bf16.msra.mxu0 %v4010_v59 }
 0x32d   : > { %3551 = vmatprep.subr.bf16.mxu0 %v4011_v18 }
 0x330   : > { %3552 = vmatpush3.bf16.msra.mxu0 %v4011_v18 }
 0x331   : > { %3553 = vmatprep.subr.bf16.mxu0 %v4012_v29 }
 0x332   : > { %1870 = vmatmul.mubr.bf16.gmra.mrb[64].mxu1 %v5249_v49  ;;  %2282 = vmatmul.mubr.bf16.gmra.mrb[28].mxu0 %v5270_v57  ;;  %v2031_v49 = vld [vmem:[#allocation2 + $0xe8] sm:$0xff] }
 0x333   : > { %1877 = vmatprep.mubr.bf16.mxu1 %v5253_v53  ;;  %2289 = vmatprep.mubr.bf16.mxu0 %v5272_v5 }
 0x334   : > { %3554 = vmatpush3.bf16.msra.mxu0 %v4012_v29 }
 0x335   : > { %3555 = vmatprep.subr.bf16.mxu0 %v4013_v35 }
 0x338   : > { %3556 = vmatpush3.bf16.msra.mxu0 %v4013_v35 }
 0x33a   : > { %1878 = vmatmul.mubr.bf16.gmra.mrb[68].mxu1 %v5261_v62  ;;  %2290 = vmatmul.mubr.bf16.gmra.mrb[32].mxu0 %v5278_v25 }
 0x33b   : > { %1885 = vmatprep.mubr.bf16.mxu1 %v5265_v50  ;;  %2297 = vmatprep.mubr.bf16.mxu0 %v5280_v7 }
 0x342   : > { %1886 = vmatmul.mubr.bf16.gmra.mrb[72].mxu1 %v5270_v57  ;;  %2298 = vmatmul.mubr.bf16.gmra.mrb[36].mxu0 %v5286_v21 }
 0x343   : > { %1893 = vmatprep.mubr.bf16.mxu1 %v5272_v5  ;;  %2305 = vmatprep.mubr.bf16.mxu0 %v5288_v34 }
 0x34a   : > { %1894 = vmatmul.mubr.bf16.gmra.mrb[76].mxu1 %v5278_v25  ;;  %2306 = vmatmul.mubr.bf16.gmra.mrb[40].mxu0 %v5294_v39 }
 0x34b   : > { %1901 = vmatprep.mubr.bf16.mxu1 %v5280_v7  ;;  %2313 = vmatprep.mubr.bf16.mxu0 %v2030_v40 }
 0x352   : > { %1902 = vmatmul.mubr.bf16.gmra.mrb[80].mxu1 %v5286_v21  ;;  %2314 = vmatmul.mubr.bf16.gmra.mrb[44].mxu0 %v2029_v44 }
 0x353   : > { %3557 = vmatprep.mubr.bf16.mxu0 %v5227_v31 }
 0x35a   : > { %3558 = vmatmul.mubr.bf16.vlgmr.msra.gmra.mrb[0].mxu0 %v5231_v22 }
 0x35b   : > { %3561 = vmatprep.mubr.bf16.mxu0 %v5239_v38 }
 0x362   : > { %3562 = vmatmul.mubr.bf16.gmra.mrb[4].mxu0 %v5243_v42 }
 0x363   : > { %3565 = vmatprep.mubr.bf16.mxu0 %v5251_v48 }
 0x36a   : > { %3566 = vmatmul.mubr.bf16.gmra.mrb[8].mxu0 %v5255_v54 }
 0x36b   : > { %3569 = vmatprep.mubr.bf16.mxu0 %v5263_v51 }
 0x372   : > { %3570 = vmatmul.mubr.bf16.gmra.mrb[12].mxu0 %v2031_v49 }
 0x3ad   : > { %v3217_v53 = vpop.f32.mrb[20].mxu1 }
 0x3ae   : > { %v3218_v62 = vpop.f32.mrb[21].mxu1 }
 0x3af   : > { %v3219_v43 = vadd.f32 %v3218_v62, %v3217_v53  ;;  %v3220_v50 = vpop.f32.mrb[22].mxu1 }
 0x3b0   : > { %v3221_v63 = vpop.f32.mrb[23].mxu1 }
 0x3b1   : > { %v3222_v31 = vadd.f32 %v3221_v63, %v3220_v50 }
 0x3b5   : > { %v3223_v0 = vpop.f32.mrb[24].mxu1 }
 0x3b6   : > { %v3224_v22 = vpop.f32.mrb[25].mxu1 }
 0x3b7   : > { %v5333_v36 = vadd.f32 %v3224_v22, %v3223_v0  ;;  %v3226_v38 = vpop.f32.mrb[26].mxu1 }
 0x3b8   : > { %v3227_v42 = vpop.f32.mrb[27].mxu1 }
 0x3b9   : > { %v5335_v1 = vadd.f32 %v3227_v42, %v3226_v38 }
 0x3bd   : > { %v3229_v48 = vpop.f32.mrb[28].mxu1 }
 0x3be   : > { %v3230_v54 = vpop.f32.mrb[29].mxu1 }
 0x3bf   : > { %v5337_v2 = vadd.f32 %v3230_v54, %v3229_v48  ;;  %v3232_v51 = vpop.f32.mrb[30].mxu1 }
 0x3c0   : > { %v3233_v57 = vpop.f32.mrb[31].mxu1 }
 0x3c1   : > { %v5339_v3 = vadd.f32 %v3233_v57, %v3232_v51 }
 0x3c5   : > { %v3235_v26 = vpop.f32.mrb[32].mxu1 }
 0x3c6   : > { %v3236_v5 = vpop.f32.mrb[33].mxu1 }
 0x3c7   : > { %v5341_v6 = vadd.f32 %v3236_v5, %v3235_v26  ;;  %v3238_v8 = vpop.f32.mrb[34].mxu1 }
 0x3c8   : > { %v3239_v61 = vpop.f32.mrb[35].mxu1 }
 0x3c9   : > { %v5343_v23 = vadd.f32 %v3239_v61, %v3238_v8 }
 0x3cd   : > { %v3241_v4 = vpop.f32.mrb[36].mxu1 }
 0x3ce   : > { %v3242_v25 = vpop.f32.mrb[37].mxu1 }
 0x3cf   : > { %v5345_v41 = vadd.f32 %v3242_v25, %v3241_v4  ;;  %v3244_v24 = vpop.f32.mrb[38].mxu1 }
 0x3d0   : > { %v3245_v7 = vpop.f32.mrb[39].mxu1 }
 0x3d1   : > { %v5347_v52 = vadd.f32 %v3245_v7, %v3244_v24 }
 0x3d5   : > { %v3247_v20 = vpop.f32.mrb[40].mxu1 }
 0x3d6   : > { %v3248_v56 = vpop.f32.mrb[41].mxu1 }
 0x3d7   : > { %v5349_v30 = vadd.f32 %v3248_v56, %v3247_v20  ;;  %v3250_v21 = vpop.f32.mrb[42].mxu1 }
 0x3d8   : > { %v3251_v32 = vpop.f32.mrb[43].mxu1 }
 0x3d9   : > { %v5351_v27 = vadd.f32 %v3251_v32, %v3250_v21 }
 0x3dd   : > { %v3253_v34 = vpop.f32.mrb[44].mxu1 }
 0x3de   : > { %v3254_v37 = vpop.f32.mrb[45].mxu1 }
 0x3df   : > { %v5353_v28 = vadd.f32 %v3254_v37, %v3253_v34  ;;  %v3256_v39 = vpop.f32.mrb[46].mxu1 }
 0x3e0   : > { %v3257_v45 = vpop.f32.mrb[47].mxu1 }
 0x3e1   : > { %v5355_v46 = vadd.f32 %v3257_v45, %v3256_v39 }
 0x3e5   : > { %v3259_v17 = vpop.f32.mrb[48].mxu1 }
 0x3e6   : > { %v3260_v47 = vpop.f32.mrb[49].mxu1 }
 0x3e7   : > { %v5357_v60 = vadd.f32 %v3260_v47, %v3259_v17  ;;  %v3262_v33 = vpop.f32.mrb[50].mxu1 }
 0x3e8   : > { %v3263_v19 = vpop.f32.mrb[51].mxu1 }
 0x3e9   : > { %v5359_v55 = vadd.f32 %v3263_v19, %v3262_v33 }
 0x3ed   : > { %v3297_v58 = vpop.f32.mrb[52].mxu1  ;;  %v3377_v59 = vpop.f32.mrb[16].mxu0 }
 0x3ee   : > { %v3298_v18 = vpop.f32.mrb[53].mxu1  ;;  %v3378_v29 = vpop.f32.mrb[17].mxu0 }
 0x3ef   : > { %v3299_v35 = vadd.f32 %v3298_v18, %v3297_v58  ;;  %v3379_v40 = vadd.f32 %v3378_v29, %v3377_v59  ;;  %v3300_v44 = vpop.f32.mrb[54].mxu1  ;;  %v3380_v49 = vpop.f32.mrb[18].mxu0 }
 0x3f0   : > { %v3301_v53 = vpop.f32.mrb[55].mxu1  ;;  %v3381_v62 = vpop.f32.mrb[19].mxu0 }
 0x3f1   : > { %v3576_v50 = vadd.f32 %v3299_v35, %v3219_v43  ;;  %v3302_v63 = vadd.f32 %v3301_v53, %v3300_v44  ;;  %v3382_v0 = vadd.f32 %v3381_v62, %v3380_v49 }
 0x3f3   : > { %v3582_v22 = vadd.f32 %v3302_v63, %v3222_v31  ;;  %v5361_v38 = vadd.f32 %v3576_v50, %v3379_v40 }
 0x3f5   : > { %v3303_v42 = vpop.f32.mrb[56].mxu1  ;;  %v3383_v48 = vpop.f32.mrb[20].mxu0  ;;  %v5363_v54 = vadd.f32 %v3582_v22, %v3382_v0 }
 0x3f6   : > { %v3304_v51 = vpop.f32.mrb[57].mxu1  ;;  %v3384_v57 = vpop.f32.mrb[21].mxu0 }
 0x3f7   : > { %v3305_v26 = vadd.f32 %v3304_v51, %v3303_v42  ;;  %v3385_v5 = vadd.f32 %v3384_v57, %v3383_v48  ;;  %v3306_v8 = vpop.f32.mrb[58].mxu1  ;;  %v3386_v61 = vpop.f32.mrb[22].mxu0 }
 0x3f8   : > { %v3307_v4 = vpop.f32.mrb[59].mxu1  ;;  %v3387_v25 = vpop.f32.mrb[23].mxu0 }
 0x3f9   : > { %v3573_v24 = vadd.f32 %v3305_v26, %v5333_v36  ;;  %v3308_v43 = vadd.f32 %v3307_v4, %v3306_v8  ;;  %v3388_v7 = vadd.f32 %v3387_v25, %v3386_v61 }
 0x3fb   : > { %v3579_v31 = vadd.f32 %v3308_v43, %v5335_v1  ;;  %v5367_v20 = vadd.f32 %v3573_v24, %v3385_v5 }
 0x3fd   : > { %v3309_v56 = vpop.f32.mrb[60].mxu1  ;;  %v3389_v21 = vpop.f32.mrb[24].mxu0  ;;  %v5369_v32 = vadd.f32 %v3579_v31, %v3388_v7 }
 0x3fe   : > { %v3310_v34 = vpop.f32.mrb[61].mxu1  ;;  %v3390_v37 = vpop.f32.mrb[25].mxu0 }
 0x3ff   : > { %v3311_v39 = vadd.f32 %v3310_v34, %v3309_v56  ;;  %v3391_v45 = vadd.f32 %v3390_v37, %v3389_v21  ;;  %v3312_v17 = vpop.f32.mrb[62].mxu1  ;;  %v3392_v47 = vpop.f32.mrb[26].mxu0 }
 0x400   : > { %v3313_v33 = vpop.f32.mrb[63].mxu1  ;;  %v3393_v19 = vpop.f32.mrb[27].mxu0 }
 0x401   : > { %v3588_v36 = vadd.f32 %v3311_v39, %v5337_v2  ;;  %v3314_v58 = vadd.f32 %v3313_v33, %v3312_v17  ;;  %v3394_v59 = vadd.f32 %v3393_v19, %v3392_v47 }
 0x403   : > { %v3594_v1 = vadd.f32 %v3314_v58, %v5339_v3  ;;  %v5373_v18 = vadd.f32 %v3588_v36, %v3391_v45 }
 0x405   : > { %v3315_v29 = vpop.f32.mrb[64].mxu1  ;;  %v3395_v35 = vpop.f32.mrb[28].mxu0  ;;  %v5375_v40 = vadd.f32 %v3594_v1, %v3394_v59 }
 0x406   : > { %v3316_v44 = vpop.f32.mrb[65].mxu1  ;;  %v3396_v49 = vpop.f32.mrb[29].mxu0 }
 0x407   : > { %v3317_v53 = vadd.f32 %v3316_v44, %v3315_v29  ;;  %v3397_v62 = vadd.f32 %v3396_v49, %v3395_v35  ;;  %v3318_v50 = vpop.f32.mrb[66].mxu1  ;;  %v3398_v63 = vpop.f32.mrb[30].mxu0 }
 0x408   : > { %v3319_v0 = vpop.f32.mrb[67].mxu1  ;;  %v3399_v22 = vpop.f32.mrb[31].mxu0 }
 0x409   : > { %v3585_v2 = vadd.f32 %v3317_v53, %v5341_v6  ;;  %v3320_v42 = vadd.f32 %v3319_v0, %v3318_v50  ;;  %v3400_v48 = vadd.f32 %v3399_v22, %v3398_v63 }
 0x40b   : > { %v3591_v3 = vadd.f32 %v3320_v42, %v5343_v23  ;;  %v5379_v51 = vadd.f32 %v3585_v2, %v3397_v62 }
 0x40d   : > { %v3321_v57 = vpop.f32.mrb[68].mxu1  ;;  %v3401_v26 = vpop.f32.mrb[32].mxu0  ;;  %v5381_v5 = vadd.f32 %v3591_v3, %v3400_v48 }
 0x40e   : > { %v3322_v8 = vpop.f32.mrb[69].mxu1  ;;  %v3402_v61 = vpop.f32.mrb[33].mxu0 }
 0x40f   : > { %v3323_v4 = vadd.f32 %v3322_v8, %v3321_v57  ;;  %v3403_v25 = vadd.f32 %v3402_v61, %v3401_v26  ;;  %v3324_v24 = vpop.f32.mrb[70].mxu1  ;;  %v3404_v43 = vpop.f32.mrb[34].mxu0 }
 0x410   : > { %v3325_v7 = vpop.f32.mrb[71].mxu1  ;;  %v3405_v31 = vpop.f32.mrb[35].mxu0 }
 0x411   : > { %v3600_v6 = vadd.f32 %v3323_v4, %v5345_v41  ;;  %v3326_v56 = vadd.f32 %v3325_v7, %v3324_v24  ;;  %v3406_v21 = vadd.f32 %v3405_v31, %v3404_v43 }
 0x413   : > { %v3606_v23 = vadd.f32 %v3326_v56, %v5347_v52  ;;  %v5385_v34 = vadd.f32 %v3600_v6, %v3403_v25 }
 0x415   : > { %v3327_v37 = vpop.f32.mrb[72].mxu1  ;;  %v3407_v39 = vpop.f32.mrb[36].mxu0  ;;  %v5387_v45 = vadd.f32 %v3606_v23, %v3406_v21 }
 0x416   : > { %v3328_v17 = vpop.f32.mrb[73].mxu1  ;;  %v3408_v47 = vpop.f32.mrb[37].mxu0 }
 0x417   : > { %v3329_v33 = vadd.f32 %v3328_v17, %v3327_v37  ;;  %v3409_v19 = vadd.f32 %v3408_v47, %v3407_v39  ;;  %v3330_v36 = vpop.f32.mrb[74].mxu1  ;;  %v3410_v58 = vpop.f32.mrb[38].mxu0 }
 0x418   : > { %v3331_v59 = vpop.f32.mrb[75].mxu1  ;;  %v3411_v1 = vpop.f32.mrb[39].mxu0 }
 0x419   : > { %v3597_v41 = vadd.f32 %v3329_v33, %v5349_v30  ;;  %v3332_v29 = vadd.f32 %v3331_v59, %v3330_v36  ;;  %v3412_v35 = vadd.f32 %v3411_v1, %v3410_v58  ;;  %v5405_v33 = vld [vmem:[#allocation14] ss:$0 sm:$0xff] }
 0x41b   : > { %v3603_v52 = vadd.f32 %v3332_v29, %v5351_v27  ;;  %v5391_v44 = vadd.f32 %v3597_v41, %v3409_v19 }
 0x41d   : > { %v3333_v49 = vpop.f32.mrb[76].mxu1  ;;  %v3413_v53 = vpop.f32.mrb[40].mxu0  ;;  %v5393_v62 = vadd.f32 %v3603_v52, %v3412_v35 }
 0x41e   : > { %v3334_v50 = vpop.f32.mrb[77].mxu1  ;;  %v3414_v63 = vpop.f32.mrb[41].mxu0 }
 0x41f   : > { %v3335_v0 = vadd.f32 %v3334_v50, %v3333_v49  ;;  %v3415_v22 = vadd.f32 %v3414_v63, %v3413_v53  ;;  %v3336_v2 = vpop.f32.mrb[78].mxu1  ;;  %v3416_v42 = vpop.f32.mrb[42].mxu0 }
 0x420   : > { %v3337_v48 = vpop.f32.mrb[79].mxu1  ;;  %v3417_v3 = vpop.f32.mrb[43].mxu0 }
 0x421   : > { %v3612_v30 = vadd.f32 %v3335_v0, %v5353_v28  ;;  %v3338_v57 = vadd.f32 %v3337_v48, %v3336_v2  ;;  %v3418_v26 = vadd.f32 %v3417_v3, %v3416_v42 }
 0x423   : > { %v3618_v27 = vadd.f32 %v3338_v57, %v5355_v46  ;;  %v5397_v8 = vadd.f32 %v3612_v30, %v3415_v22 }
 0x425   : > { %v3339_v61 = vpop.f32.mrb[80].mxu1  ;;  %v3419_v4 = vpop.f32.mrb[44].mxu0  ;;  %v5399_v25 = vadd.f32 %v3618_v27, %v3418_v26 }
 0x426   : > { %v3340_v24 = vpop.f32.mrb[81].mxu1  ;;  %v3420_v43 = vpop.f32.mrb[45].mxu0 }
 0x427   : > { %v3341_v7 = vadd.f32 %v3340_v24, %v3339_v61  ;;  %v3421_v31 = vadd.f32 %v3420_v43, %v3419_v4  ;;  %v3342_v6 = vpop.f32.mrb[82].mxu1  ;;  %v3422_v56 = vpop.f32.mrb[46].mxu0 }
 0x428   : > { %v3343_v21 = vpop.f32.mrb[83].mxu1  ;;  %v3423_v23 = vpop.f32.mrb[47].mxu0 }
 0x429   : > { %v3609_v28 = vadd.f32 %v3341_v7, %v5357_v60  ;;  %v3344_v37 = vadd.f32 %v3343_v21, %v3342_v6  ;;  %v3424_v39 = vadd.f32 %v3423_v23, %v3422_v56  ;;  %v2652_v7 = vunpack.c.l.bf16 %v4980_v10 }
 0x42b   : > { %v3615_v46 = vadd.f32 %v3344_v37, %v5359_v55  ;;  %v5403_v17 = vadd.f32 %v3609_v28, %v3421_v31  ;;  %v2653_v37 = vunpack.c.h.bf16 %v4980_v10 }
 0x42d   : > { %v3559_v47 = vpop.f32.mrb[0].mxu0  ;;  %v5407_v19 = vadd.f32 %v3615_v46, %v3424_v39 }
 0x42e   : > { %v3575_v36 = vadd.f32 %v5367_v20, %v3559_v47  ;;  %v2356_v58 = vpop.f32.mrb[1].mxu0 }
 0x42f   : > { %v3578_v59 = vadd.f32 %v5361_v38, %v2356_v58  ;;  %v3560_v1 = vpop.f32.mrb[2].mxu0  ;;  %v2651_v58 = vunpack.c.h.bf16 %v4977_v9 }
 0x430   : > { %v5412_v41 = vadd.f32 %v3575_v36, %v5405_v33  ;;  %v3581_v60 = vadd.f32 %v5369_v32, %v3560_v1  ;;  %v2359_v29 = vpop.f32.mrb[3].mxu0 }
 0x431   : > { %v5416_v55 = vadd.f32 %v3578_v59, %v5405_v33  ;;  %v3584_v35 = vadd.f32 %v5363_v54, %v2359_v29 }
 0x432   : > { %v2460_v52 = vmin.f32 %v5412_v41, 20.0  ;;  %v5421_v49 = vadd.f32 %v3581_v60, %v5405_v33  ;;  %vm2604_vm10 = vcmp.gt.f32.partialorder %v5412_v41, 20.0 }
 0x433   : > { %v2458_v20 = vmin.f32 %v5416_v55, 20.0  ;;  %v5425_v38 = vadd.f32 %v3584_v35, %v5405_v33  ;;  %vm2602_vm11 = vcmp.gt.f32.partialorder %v5416_v55, 20.0 }
 0x434   : > { %v2478_v53 = vmul.f32 1.442695, %v2460_v52  ;;  %v2461_v50 = vmin.f32 %v5421_v49, 20.0  ;;  %vm2605_vm12 = vcmp.gt.f32.partialorder %v5421_v49, 20.0 }
 0x435   : > { %v2474_v32 = vmul.f32 1.442695, %v2458_v20  ;;  %v2459_v63 = vmin.f32 %v5425_v38, 20.0  ;;  %v3563_v0 = vpop.f32.mrb[4].mxu0  ;;  %vm2603_vm13 = vcmp.gt.f32.partialorder %v5425_v38, 20.0 }
 0x436   : > { %4014 = vpow2.f32 %v2478_v53  ;;  %v2480_v22 = vmul.f32 1.442695, %v2461_v50  ;;  %v3587_v54 = vadd.f32 %v5379_v51, %v3563_v0  ;;  %v2372_v2 = vpop.f32.mrb[5].mxu0  ;;  %v2656_v53 = vunpack.c.l.bf16 %v4988_v12 }
 0x437   : > { %4016 = vpow2.f32 %v2474_v32  ;;  %v2476_v42 = vmul.f32 1.442695, %v2459_v63  ;;  %v3590_v48 = vadd.f32 %v5373_v18, %v2372_v2  ;;  %v3564_v3 = vpop.f32.mrb[6].mxu0 }
 0x438   : > { %4018 = vpow2.f32 %v2480_v22  ;;  %v5432_v30 = vadd.f32 %v3587_v54, %v5405_v33  ;;  %v3593_v57 = vadd.f32 %v5381_v5, %v3564_v3  ;;  %v2375_v26 = vpop.f32.mrb[7].mxu0  ;;  %v2654_v22 = vunpack.c.l.bf16 %v4985_v11 }
 0x439   : > { %4020 = vpow2.f32 %v2476_v42  ;;  %v5436_v27 = vadd.f32 %v3590_v48, %v5405_v33  ;;  %v3596_v61 = vadd.f32 %v5375_v40, %v2375_v26  ;;  %v2650_v40 = vunpack.c.l.bf16 %v4977_v9 }
 0x43a   : > { %v2464_v51 = vmin.f32 %v5432_v30, 20.0  ;;  %v5441_v4 = vadd.f32 %v3593_v57, %v5405_v33  ;;  %v2657_v26 = vunpack.c.h.bf16 %v4988_v12  ;;  %vm2608_vm14 = vcmp.gt.f32.partialorder %v5432_v30, 20.0 }
 0x43b   : > { %v2462_v18 = vmin.f32 %v5436_v27, 20.0  ;;  %v5445_v24 = vadd.f32 %v3596_v61, %v5405_v33  ;;  %vm2606_vm15 = vcmp.gt.f32.partialorder %v5436_v27, 20.0 }
 0x43c   : > { %v2486_v43 = vmul.f32 1.442695, %v2464_v51  ;;  %v2465_v5 = vmin.f32 %v5441_v4, 20.0  ;;  %vm2609_vm0 = vcmp.gt.f32.partialorder %v5441_v4, 20.0 }
 0x43d   : > { %v2482_v31 = vmul.f32 1.442695, %v2462_v18  ;;  %v2463_v6 = vmin.f32 %v5445_v24, 20.0  ;;  %v3567_v56 = vpop.f32.mrb[8].mxu0  ;;  %vm2607_vm1 = vcmp.gt.f32.partialorder %v5445_v24, 20.0 }
 0x43e   : > { %4022 = vpow2.f32 %v2486_v43  ;;  %v2488_v21 = vmul.f32 1.442695, %v2465_v5  ;;  %v3599_v23 = vadd.f32 %v5391_v44, %v3567_v56  ;;  %v2388_v28 = vpop.f32.mrb[9].mxu0 }
 0x43f   : > { %4024 = vpow2.f32 %v2482_v31  ;;  %v2484_v39 = vmul.f32 1.442695, %v2463_v6  ;;  %v3602_v46 = vadd.f32 %v5385_v34, %v2388_v28  ;;  %v3568_v47 = vpop.f32.mrb[10].mxu0 }
 0x440   : > { %v4015_v36 = vpop.eup %4014  ;;  %4026 = vpow2.f32 %v2488_v21  ;;  %v5456_v59 = vadd.f32 %v3599_v23, %v5405_v33  ;;  %v3605_v1 = vadd.f32 %v5393_v62, %v3568_v47  ;;  %v2391_v60 = vpop.f32.mrb[11].mxu0 }
 0x441   : > { %v4017_v29 = vpop.eup %4016  ;;  %v2508_v44 = vadd.f32 2.0, %v4015_v36  ;;  %4028 = vpow2.f32 %v2484_v39  ;;  %v5460_v35 = vadd.f32 %v3602_v46, %v5405_v33  ;;  %v3608_v52 = vadd.f32 %v5387_v45, %v2391_v60 }
 0x442   : > { %v4019_v34 = vpop.eup %4018  ;;  %v2506_v20 = vadd.f32 2.0, %v4017_v29  ;;  %v2468_v50 = vmin.f32 %v5456_v59, 20.0  ;;  %v5466_v32 = vadd.f32 %v3605_v1, %v5405_v33  ;;  %vm2612_vm2 = vcmp.gt.f32.partialorder %v5456_v59, 20.0 }
 0x443   : > { %v4021_v63 = vpop.eup %4020  ;;  %v2524_v62 = vmul.f32 %v4015_v36, %v2508_v44  ;;  %v2509_v0 = vadd.f32 2.0, %v4019_v34  ;;  %v2466_v54 = vmin.f32 %v5460_v35, 20.0  ;;  %v5473_v56 = vadd.f32 %v3608_v52, %v5405_v33 }
 0x444   : > { %v2522_v2 = vmul.f32 %v4017_v29, %v2506_v20  ;;  %v2507_v42 = vadd.f32 2.0, %v4021_v63  ;;  %v2494_v48 = vmul.f32 1.442695, %v2468_v50  ;;  %v2469_v45 = vmin.f32 %v5466_v32, 20.0 }
 0x445   : > { %v2540_v3 = vadd.f32 2.0, %v2524_v62  ;;  %v2525_v57 = vmul.f32 %v4019_v34, %v2509_v0  ;;  %v2490_v61 = vmul.f32 1.442695, %v2466_v54  ;;  %v3571_v51 = vpop.f32.mrb[12].mxu0  ;;  %v2655_v29 = vunpack.c.h.bf16 %v4985_v11 }
 0x446   : > { %v2538_v18 = vadd.f32 2.0, %v2522_v2  ;;  %v2523_v43 = vmul.f32 %v4021_v63, %v2507_v42  ;;  %4030 = vpow2.f32 %v2494_v48  ;;  %v2496_v5 = vmul.f32 1.442695, %v2469_v45  ;;  %v2404_v31 = vpop.f32.mrb[13].mxu0 }
 0x447   : > { %4032 = vrcp.f32 %v2540_v3  ;;  %v2541_v6 = vadd.f32 2.0, %v2525_v57  ;;  %v3611_v21 = vadd.f32 %v5403_v17, %v3571_v51  ;;  %v3572_v23 = vpop.f32.mrb[14].mxu0  ;;  %v3614_v46 = vadd.f32 %v5397_v8, %v2404_v31 }
 0x448   : > { %v4023_v28 = vpop.eup %4022  ;;  %4034 = vrcp.f32 %v2538_v18  ;;  %v2539_v39 = vadd.f32 2.0, %v2523_v43  ;;  %v3617_v47 = vadd.f32 %v5407_v19, %v3572_v23  ;;  %v2407_v36 = vpop.f32.mrb[15].mxu0  ;;  %v2467_v44 = vmin.f32 %v5473_v56, 20.0 }
 0x449   : > { %v4025_v1 = vpop.eup %4024  ;;  %4036 = vrcp.f32 %v2541_v6  ;;  %v2512_v60 = vadd.f32 2.0, %v4023_v28  ;;  %v5481_v17 = vadd.f32 %v3611_v21, %v5405_v33  ;;  %v5484_v20 = vadd.f32 %v3614_v46, %v5405_v33 }
 0x44a   : > { %v4027_v52 = vpop.eup %4026  ;;  %4038 = vrcp.f32 %v2539_v39  ;;  %v2510_v34 = vadd.f32 2.0, %v4025_v1  ;;  %v2492_v63 = vmul.f32 1.442695, %v2467_v44  ;;  %v5491_v51 = vadd.f32 %v3617_v47, %v5405_v33 }
 0x44b   : > { %v4029_v8 = vpop.eup %4028  ;;  %v2528_v50 = vmul.f32 %v4023_v28, %v2512_v60  ;;  %v2513_v19 = vadd.f32 2.0, %v4027_v52  ;;  %4040 = vpow2.f32 %v2490_v61  ;;  %v2472_v54 = vmin.f32 %v5481_v17, 20.0 }
 0x44c   : > { %v2526_v62 = vmul.f32 %v4025_v1, %v2510_v34  ;;  %v2511_v0 = vadd.f32 2.0, %v4029_v8  ;;  %4042 = vpow2.f32 %v2496_v5  ;;  %v2470_v3 = vmin.f32 %v5484_v20, 20.0 }
 0x44d   : > { %v2544_v2 = vadd.f32 2.0, %v2528_v50  ;;  %v2529_v42 = vmul.f32 %v4027_v52, %v2513_v19  ;;  %4044 = vpow2.f32 %v2492_v63  ;;  %v2502_v61 = vmul.f32 1.442695, %v2472_v54 }
 0x44e   : > { %v2542_v48 = vadd.f32 2.0, %v2526_v62  ;;  %v2527_v45 = vmul.f32 %v4029_v8, %v2511_v0  ;;  %v2498_v5 = vmul.f32 1.442695, %v2470_v3  ;;  %v3620_v31 = vadd.f32 %v5399_v25, %v2407_v36 }
 0x44f   : > { %4046 = vrcp.f32 %v2544_v2  ;;  %v2545_v57 = vadd.f32 2.0, %v2529_v42  ;;  %v2473_v23 = vmin.f32 %v5491_v51, 20.0  ;;  %vm2610_vm3 = vcmp.gt.f32.partialorder %v5460_v35, 20.0 }
 0x450   : > { %v4031_v18 = vpop.eup %4030  ;;  %4048 = vrcp.f32 %v2542_v48  ;;  %v2543_v43 = vadd.f32 2.0, %v2527_v45  ;;  %v5498_v46 = vadd.f32 %v3620_v31, %v5405_v33  ;;  %vm2613_vm4 = vcmp.gt.f32.partialorder %v5466_v32, 20.0 }
 0x451   : > { %v4033_v6 = vpop.eup %4032  ;;  %4050 = vrcp.f32 %v2545_v57  ;;  %v2516_v21 = vadd.f32 2.0, %v4031_v18  ;;  %v2504_v25 = vmul.f32 1.442695, %v2473_v23  ;;  %vm2611_vm5 = vcmp.gt.f32.partialorder %v5473_v56, 20.0 }
 0x452   : > { %v4035_v28 = vpop.eup %4034  ;;  %v2572_v39 = vmul.f32 2.0, %v4033_v6  ;;  %4052 = vrcp.f32 %v2543_v43  ;;  %v2471_v34 = vmin.f32 %v5498_v46, 20.0  ;;  %vm2616_vm6 = vcmp.gt.f32.partialorder %v5481_v17, 20.0 }
 0x453   : > { %v4037_v47 = vpop.eup %4036  ;;  %v2570_v1 = vmul.f32 2.0, %v4035_v28  ;;  %v2532_v60 = vmul.f32 %v4031_v18, %v2516_v21  ;;  %4054 = vpow2.f32 %v2502_v61  ;;  %vm2617_vm7 = vcmp.gt.f32.partialorder %v5491_v51, 20.0 }
 0x454   : > { %v4039_v36 = vpop.eup %4038  ;;  %v2588_v44 = vsub.f32 1.0, %v2572_v39  ;;  %v2573_v52 = vmul.f32 2.0, %v4037_v47  ;;  %4056 = vpow2.f32 %v2498_v5  ;;  %v5505_v2 = vmul.f32 1.442695, %v2471_v34 }
 0x455   : > { %v4041_v8 = vpop.eup %4040  ;;  %v2586_v50 = vsub.f32 1.0, %v2570_v1  ;;  %v2571_v19 = vmul.f32 2.0, %v4039_v36  ;;  %v2548_v63 = vadd.f32 2.0, %v2532_v60  ;;  %4058 = vpow2.f32 %v2504_v25 }
 0x456   : > { %v4043_v33 = vpop.eup %4042  ;;  %v2620_v62 = vsel %vm2604_vm10, 1.0, %v2588_v44  ;;  %v2589_v0 = vsub.f32 1.0, %v2573_v52  ;;  %v2514_v54 = vadd.f32 2.0, %v4041_v8  ;;  %vm2614_vm8 = vcmp.gt.f32.partialorder %v5484_v20, 20.0 }
 0x457   : > { %v4045_v42 = vpop.eup %4044  ;;  %v2636_v48 = vmul.f32 %v2620_v62, %v5412_v41  ;;  %v2618_v45 = vsel %vm2602_vm11, 1.0, %v2586_v50  ;;  %v2587_v3 = vsub.f32 1.0, %v2571_v19  ;;  %4060 = vrcp.f32 %v2548_v63 }
 0x458   : > { %v2634_v57 = vmul.f32 %v2618_v45, %v5416_v55  ;;  %v2621_v61 = vsel %vm2605_vm12, 1.0, %v2589_v0  ;;  %v2530_v18 = vmul.f32 %v4041_v8, %v2514_v54  ;;  %v2517_v43 = vadd.f32 2.0, %v4043_v33 }
 0x459   : > { %v4047_v5 = vpop.eup %4046  ;;  %v2668_v41 = vadd.f32 %v2652_v7, %v2636_v48  ;;  %v2637_v31 = vmul.f32 %v2621_v61, %v5421_v49  ;;  %v2619_v6 = vsel %vm2603_vm13, 1.0, %v2587_v3  ;;  %v2515_v21 = vadd.f32 2.0, %v4045_v42 }
 0x45a   : > { %v4049_v23 = vpop.eup %4048  ;;  %v2666_v55 = vadd.f32 %v2650_v40, %v2634_v57  ;;  %v2635_v28 = vmul.f32 %v2619_v6, %v5425_v38  ;;  %v2576_v39 = vmul.f32 2.0, %v4047_v5  ;;  %v2546_v47 = vadd.f32 2.0, %v2530_v18 }
 0x45b   : > { %v4051_v1 = vpop.eup %4050  ;;  %v2669_v60 = vadd.f32 %v2653_v37, %v2637_v31  ;;  %v2574_v25 = vmul.f32 2.0, %v4049_v23  ;;  %v2533_v7 = vmul.f32 %v4043_v33, %v2517_v43  ;;  %v2531_v36 = vmul.f32 %v4045_v42, %v2515_v21 }
 0x45c   : > { %v4053_v49 = vpop.eup %4052  ;;  %v2667_v44 = vadd.f32 %v2651_v58, %v2635_v28  ;;  %v2592_v52 = vsub.f32 1.0, %v2576_v39  ;;  %v2577_v34 = vmul.f32 2.0, %v4051_v1  ;;  %4062 = vrcp.f32 %v2546_v47 }
 0x45d   : > { %v4055_v40 = vpop.eup %4054  ;;  %v3144_v38 = vpack.c.bf16 %v2669_v60, %v2668_v41  ;;  %v2590_v8 = vsub.f32 1.0, %v2574_v25  ;;  %v2575_v50 = vmul.f32 2.0, %v4053_v49  ;;  %v2549_v19 = vadd.f32 2.0, %v2533_v7 }
 0x45e   : > { %v4057_v63 = vpop.eup %4056  ;;  %v3139_v10 = vpack.c.bf16 %v2667_v44, %v2666_v55  ;;  %v2624_v37 = vsel %vm2608_vm14, 1.0, %v2592_v52  ;;  %v2593_v33 = vsub.f32 1.0, %v2577_v34  ;;  %v2547_v62 = vadd.f32 2.0, %v2531_v36 }
 0x45f   : > { %v4059_v0 = vpop.eup %4058  ;;  %3176 = vst [vmem:[%s5215_s15 + $0x8] sm:$0xff] %v3144_v38   ;;  %v2640_v9 = vmul.f32 %v2624_v37, %v5432_v30  ;;  %v2622_v58 = vsel %vm2606_vm15, 1.0, %v2590_v8  ;;  %v2591_v54 = vsub.f32 1.0, %v2575_v50  ;;  %4064 = vrcp.f32 %v2549_v19 }
 0x460   : > { %3140 = vst [vmem:[%s5215_s15] sm:$0xff] %v3139_v10   ;;  %v2638_v42 = vmul.f32 %v2622_v58, %v5436_v27  ;;  %v2625_v48 = vsel %vm2609_vm0, 1.0, %v2593_v33  ;;  %4066 = vrcp.f32 %v2547_v62  ;;  %v2520_v45 = vadd.f32 2.0, %v4055_v40 }
 0x461   : > { %v4061_v3 = vpop.eup %4060  ;;  %v2641_v57 = vmul.f32 %v2625_v48, %v5441_v4  ;;  %v2623_v61 = vsel %vm2607_vm1, 1.0, %v2591_v54  ;;  %v2518_v30 = vadd.f32 2.0, %v4057_v63  ;;  %v2672_v18 = vadd.f32 %v2656_v53, %v2640_v9 }
 0x462   : > { %v2639_v43 = vmul.f32 %v2623_v61, %v5445_v24  ;;  %v2580_v5 = vmul.f32 2.0, %v4061_v3  ;;  %v2536_v27 = vmul.f32 %v4055_v40, %v2520_v45  ;;  %v2521_v6 = vadd.f32 2.0, %v4059_v0 }
 0x463   : > { %v2673_v41 = vadd.f32 %v2657_v26, %v2641_v57  ;;  %v2534_v31 = vmul.f32 %v4057_v63, %v2518_v30  ;;  %4068 = vpow2.f32 %v5505_v2  ;;  %v2670_v4 = vadd.f32 %v2654_v22, %v2638_v42 }
 0x464   : > { %v2671_v21 = vadd.f32 %v2655_v29, %v2639_v43  ;;  %v2552_v53 = vadd.f32 2.0, %v2536_v27  ;;  %v2537_v24 = vmul.f32 %v4059_v0, %v2521_v6  ;;  %v2596_v39 = vsub.f32 1.0, %v2580_v5 }
 0x465   : > { %v3154_v23 = vpack.c.bf16 %v2673_v41, %v2672_v18  ;;  %v2550_v12 = vadd.f32 2.0, %v2534_v31  ;;  %v2660_v7 = vunpack.c.l.bf16 %v4996_v14  ;;  %v2658_v36 = vunpack.c.l.bf16 %v4993_v13 }
 0x466   : > { %v4063_v55 = vpop.eup %4062  ;;  %v3149_v28 = vpack.c.bf16 %v2671_v21, %v2670_v4  ;;  %4070 = vrcp.f32 %v2552_v53  ;;  %v2553_v47 = vadd.f32 2.0, %v2537_v24  ;;  %v2628_v11 = vsel %vm2612_vm2, 1.0, %v2596_v39 }
 0x467   : > { %3178 = vst [vmem:[%s5215_s15 + $0x18] sm:$0xff] %v3154_v23   ;;  %v2578_v26 = vmul.f32 2.0, %v4063_v55  ;;  %v2661_v44 = vunpack.c.h.bf16 %v4996_v14  ;;  %v2644_v34 = vmul.f32 %v2628_v11, %v5456_v59  ;;  %v2659_v38 = vunpack.c.h.bf16 %v4993_v13 }
 0x468   : > { %3177 = vst [vmem:[%s5215_s15 + $0x10] sm:$0xff] %v3149_v28   ;;  %4072 = vrcp.f32 %v2553_v47  ;;  %v2664_v3 = vunpack.c.l.bf16 %v5004_v16  ;;  %v2665_v18 = vunpack.c.h.bf16 %v5004_v16  ;;  %vm2615_vm9 = vcmp.gt.f32.partialorder %v5498_v46, 20.0 }
 0x469   : > { %v4065_v1 = vpop.eup %4064  ;;  %v2594_v2 = vsub.f32 1.0, %v2578_v26  ;;  %4074 = vrcp.f32 %v2550_v12  ;;  %v2676_v59 = vadd.f32 %v2660_v7, %v2644_v34  ;;  %v2663_v23 = vunpack.c.h.bf16 %v5001_v15 }
 0x46a   : > { %v4067_v22 = vpop.eup %4066  ;;  %v2581_v29 = vmul.f32 2.0, %v4065_v1 }
 0x46b   : > { %v2626_v60 = vsel %vm2610_vm3, 1.0, %v2594_v2  ;;  %v2579_v25 = vmul.f32 2.0, %v4067_v22 }
 0x46c   : > { %v2597_v49 = vsub.f32 1.0, %v2581_v29  ;;  %v2642_v8 = vmul.f32 %v2626_v60, %v5460_v35 }
 0x46d   : > { %v4069_v52 = vpop.eup %4068  ;;  %v2595_v40 = vsub.f32 1.0, %v2579_v25 }
 0x46e   : > { %v2629_v50 = vsel %vm2613_vm4, 1.0, %v2597_v49  ;;  %v2519_v19 = vadd.f32 2.0, %v4069_v52  ;;  %v2674_v9 = vadd.f32 %v2658_v36, %v2642_v8 }
 0x46f   : > { %v2645_v63 = vmul.f32 %v2629_v50, %v5466_v32  ;;  %v2627_v10 = vsel %vm2611_vm5, 1.0, %v2595_v40 }
 0x470   : > { %v4071_v37 = vpop.eup %4070  ;;  %v2643_v14 = vmul.f32 %v2627_v10, %v5473_v56  ;;  %v2535_v33 = vmul.f32 %v4069_v52, %v2519_v19 }
 0x471   : > { %v2677_v62 = vadd.f32 %v2661_v44, %v2645_v63  ;;  %v2584_v0 = vmul.f32 2.0, %v4071_v37 }
 0x472   : > { %v2675_v13 = vadd.f32 %v2659_v38, %v2643_v14  ;;  %v2551_v58 = vadd.f32 2.0, %v2535_v33  ;;  %v4073_v35 = vpop.eup %4072 }
 0x473   : > { %v3164_v54 = vpack.c.bf16 %v2677_v62, %v2676_v59  ;;  %v2600_v42 = vsub.f32 1.0, %v2584_v0  ;;  %v4075_v48 = vpop.eup %4074  ;;  %v2585_v32 = vmul.f32 2.0, %v4073_v35 }
 0x474   : > { %v3159_v45 = vpack.c.bf16 %v2675_v13, %v2674_v9  ;;  %4076 = vrcp.f32 %v2551_v58  ;;  %v2582_v30 = vmul.f32 2.0, %v4075_v48 }
 0x475   : > { %3180 = vst [vmem:[%s5215_s15 + $0x28] sm:$0xff] %v3164_v54   ;;  %v2632_v56 = vsel %vm2616_vm6, 1.0, %v2600_v42  ;;  %v2601_v57 = vsub.f32 1.0, %v2585_v32 }
 0x476   : > { %3179 = vst [vmem:[%s5215_s15 + $0x20] sm:$0xff] %v3159_v45   ;;  %v2648_v61 = vmul.f32 %v2632_v56, %v5481_v17  ;;  %v2598_v41 = vsub.f32 1.0, %v2582_v30 }
 0x477   : > { %v2633_v43 = vsel %vm2617_vm7, 1.0, %v2601_v57 }
 0x478   : > { %v2649_v5 = vmul.f32 %v2633_v43, %v5491_v51  ;;  %v2680_v27 = vadd.f32 %v2664_v3, %v2648_v61  ;;  %v2630_v21 = vsel %vm2614_vm8, 1.0, %v2598_v41  ;;  %v2662_v51 = vunpack.c.l.bf16 %v5001_v15 }
 0x479   : > { %v2646_v16 = vmul.f32 %v2630_v21, %v5484_v20 }
 0x47a   : > { %v2681_v31 = vadd.f32 %v2665_v18, %v2649_v5 }
 0x47b   : > { %v2678_v28 = vadd.f32 %v2662_v51, %v2646_v16 }
 0x47c   : > { %v3174_v6 = vpack.c.bf16 %v2681_v31, %v2680_v27 }
 0x47e   : > { %v4077_v4 = vpop.eup %4076  ;;  %3182 = vst [vmem:[%s5215_s15 + $0x38] sm:$0xff] %v3174_v6  }
 0x47f   : > { %v2583_v17 = vmul.f32 2.0, %v4077_v4 }
 0x481   : > { %v2599_v53 = vsub.f32 1.0, %v2583_v17 }
 0x483   : > { %v2631_v24 = vsel %vm2615_vm9, 1.0, %v2599_v53 }
 0x484   : > { %v2647_v55 = vmul.f32 %v2631_v24, %v5498_v46 }
 0x486   : > { %v2679_v39 = vadd.f32 %v2663_v23, %v2647_v55 }
 0x488   : > { %v3169_v20 = vpack.c.bf16 %v2679_v39, %v2678_v28 }
 0x48a   : > { %3181 = vst [vmem:[%s5215_s15 + $0x30] sm:$0xff] %v3169_v20  }
 0x48b   : > { %4293 = shalt.err (!%p4290_p1)
}
 0x48c   : > { %s4294_s15 = scalar_lea.hbm %s5587_s28, 1024  ;;  %s4298_s21 = scalar_lea.hbm %s5785_s20, 4096 }
 0x48d   : > { %p4295_p11 = scmp.ne.s32.totalorder %s5587_s28, %s4294_s15  ;;  %p4299_p2 = scmp.lt.u32.totalorder %s5587_s28, %s5785_s20 }
 0x48e   : > { %p4300_p12 = scmp.lt.u32.totalorder %s4298_s21, %s4294_s15  ;;  %p4302_p4 = scmp.lt.u32.totalorder %s4294_s15, %s5587_s28 }
 0x48f   : > { %p4296_p10 = pnand %p4295_p11, %p5786_p0 }
 0x490   : > { %p4301_p6 = por %p4300_p12, %p4299_p2 }
 0x491   : > { %p4297_p13 = pneg %p4296_p10 }
 0x492   : > { %p4303_p7 = por %p4302_p4, %p4301_p6 }
 0x494   : > { %p4304_p3 = pnand %p4303_p7, %p4297_p13 }
 0x496   : > { %4307 = shalt.err (!%p4304_p3)
}
 0x497   : > { %s4456_s23 = smov 64   ;;  %s4457_s13 = smov 4  }
 0x498   : > { %3675 = dma.vmem_to_hbm [thread:$0]  (%p5786_p0), %s5582_s12, 1024, %s5587_s28, %s2763_s18, %s4456_s23, %s4456_s23, %s4457_s13  }
 0x499 PF: > { %p3713_p9 = scmp.ge.s32.totalorder %s4442_s14, 2  ;;  %s2794_s0 = sand.u32 1, %s4414_s30  }
 0x49a   : > { %p5787_p8 = scmp.ne.s32.totalorder %s5747_s24, 0  ;;  %s2795_s10 = scalar_lea.sflag [#allocation5], %s2794_s0 }
 0x49c   : > { %p3701_p5 = pnand %p3713_p9, %p5787_p8 }
 0x49e   : > { %4385 = dma.done.wait (!%p3701_p5), %s2795_s10, 1024  }
 0x49f   : > { %4387 = vsyncadd (!%p3701_p5), %s2795_s10, 4294966272  ;;  %s28_s14 = sadd.s32 1, %s4442_s14   ;;  %s5789_s24 = sld [smem:[#allocation23_spill]] }
 0x4a0   : > { %p5619_p1 = scmp.ge.s32.totalorder %s28_s14, 6   ;;  %s5790_s25 = sld [smem:[#allocation24_spill]] }
 0x4a1   : > { %s5791_s2 = sld [smem:[#allocation25_spill]]  ;;  %s5792_s7 = smov %s4687_s27 }
 0x4a2   : > { %s5793_s10 = sld [smem:[#allocation28_spill]]  ;;  %s5794_s12 = sld [smem:[#allocation29_spill]] }
 0x4a3   : > { %s5795_s18 = sld [smem:[#allocation31_spill]]  ;;  %s5796_s13 = sld [smem:[#allocation32_spill]] }
 0x4a4   : > { %s5798_s26 = smov %s5822_s11  ;;  %s5800_s28 = smov %s4410_s29 }
 0x4a5   : > { %s5801_s29 = smov %s5792_s7  ;;  %s5802_s30 = smov %s4418_s8 }
 0x4a6   : > { %s5803_s8 = smov %s4422_s9  ;;  %s5804_s9 = smov %s4790_s17 }
 0x4a7   : > { %s5799_s27 = smov %s5791_s2  ;;  %27 = sbr.rel (!%p5619_p1) target bundleno = 23 (0x17), region = 146 }
 0x4a8   : > { %s5805_s11 = smov %s5794_s12 }
 0x4a9   : > { %s5806_s12 = smov %s5795_s18 }
 0x4ae   :  { %2800 = vsyncpa [#allocation4], 1 }
 0x4af   :  { %2802 = vsyncpa [#allocation4 + $0x1], 1 }
 0x4b0   :  { %2803 = vsyncpa [#allocation7], 1 }
 0x4b1   :  { %2805 = vsyncpa [#allocation7 + $0x1], 1 }
 0x4b2   :  { %2806 = vsyncpa [#allocation10], 1 }
 0x4b3   :  { %2807 = vsyncpa [#allocation13], 1 }
 0x4b4   :  { %2808 = vsyncpa [#allocation5], 1 }
 0x4b5   :  { %2810 = vsyncpa [#allocation5 + $0x1], 1 }

</bundles_post_ra>
